<compile_context>
chip_gen: v5e
topology: v5e:2x2
jax: 0.10.0
libtpu: 0.0.40
codegen_flags: <defaults>
</compile_context>

<pallas_src>
import functools

import jax
import jax.numpy as jnp
from jax.experimental import pallas as pl
from jax.experimental.pallas import tpu as pltpu


def _round_up(x: int, m: int) -> int:
    return (x + m - 1) // m * m


def _pick_tile(dim: int, align: int, cap: int) -> int:
    """Largest multiple of `align` that divides `dim` and is <= cap."""
    best = align
    t = align
    limit = min(cap, dim)
    while t <= limit:
        if dim % t == 0:
            best = t
        t += align
    return best


# ---------------------------------------------------------------------------
# Tiled GEMM + bias + activation (used by every conv layer)
# ---------------------------------------------------------------------------
def _gemm_bias_act_kernel(a_ref, w_ref, b_ref, o_ref, acc_ref, *, act):
    k = pl.program_id(2)

    @pl.when(k == 0)
    def _init():
        acc_ref[...] = jnp.zeros_like(acc_ref)

    acc_ref[...] += jnp.dot(
        a_ref[...], w_ref[...], preferred_element_type=jnp.float32
    )

    @pl.when(k == pl.num_programs(2) - 1)
    def _finish():
        y = acc_ref[...] + b_ref[...]          # bias broadcast over rows (f32)
        if act == "relu":
            y = jnp.maximum(y, 0.0)
        elif act == "sigmoid":
            y = jax.nn.sigmoid(y)
        o_ref[...] = y.astype(o_ref.dtype)


def gemm_bias_act(a, w, b, act, out_dtype):
    """out = act(a @ w + b).

    a: (M, K)   float (cast to bf16 for the MXU)
    w: (Kp, Np) bf16, lane-padded at init (Kp, Np multiples of 128, Kp >= K)
    b: (1, Np)  f32
    Returns the padded (Mp, Np) result in `out_dtype`; caller slices.
    """
    M, K = a.shape
    Kp, Np = w.shape
    assert b.shape == (1, Np) and Kp >= K and Kp % 128 == 0 and Np % 128 == 0

    Mp = _round_up(M, 16)                  # bf16 sublane packing -> 16-row align
    tm = _pick_tile(Mp, 16, 256)
    tn = _pick_tile(Np, 128, 256)
    tk = _pick_tile(Kp, 128, 512)

    a = jnp.pad(a, ((0, Mp - M), (0, Kp - K))).astype(jnp.bfloat16)
    w = w.astype(jnp.bfloat16)
    b = b.astype(jnp.float32)

    grid = (Mp // tm, Np // tn, Kp // tk)
    return pl.pallas_call(
        functools.partial(_gemm_bias_act_kernel, act=act),
        out_shape=jax.ShapeDtypeStruct((Mp, Np), out_dtype),
        grid_spec=pltpu.PrefetchScalarGridSpec(
            num_scalar_prefetch=0,
            grid=grid,
            in_specs=[
                pl.BlockSpec((tm, tk), lambda i, j, k: (i, k)),
                pl.BlockSpec((tk, tn), lambda i, j, k: (k, j)),
                pl.BlockSpec((1, tn), lambda i, j, k: (0, j)),
            ],
            out_specs=pl.BlockSpec((tm, tn), lambda i, j, k: (i, j)),
            scratch_shapes=[pltpu.VMEM((tm, tn), jnp.float32)],
        ),
        compiler_params=pltpu.CompilerParams(
            dimension_semantics=("parallel", "parallel", "arbitrary")
        ),
    )(a, w, b)


# ---------------------------------------------------------------------------
# fc + sigmoid as a K-tiled VPU reduction (output-resident accumulator)
# ---------------------------------------------------------------------------
def _fc_sigmoid_kernel(x_ref, w_ref, b_ref, o_ref):
    k = pl.program_id(0)

    @pl.when(k == 0)
    def _init():
        o_ref[...] = jnp.zeros_like(o_ref)

    o_ref[...] += jnp.sum(x_ref[...] * w_ref[...], axis=-1, keepdims=True)

    @pl.when(k == pl.num_programs(0) - 1)
    def _finish():
        o_ref[...] = jax.nn.sigmoid(o_ref[...] + b_ref[...])


def fc_sigmoid(x, fw, fb):
    """x: (B, fc_in), fw: (1, fc_in) f32, fb: (1, 1) f32 -> (B, 1) f32."""
    B, K = x.shape
    Kp = _round_up(K, 128)
    Mp = _round_up(B, 8)
    tk = _pick_tile(Kp, 128, 512)

    xp = jnp.pad(x.astype(jnp.float32), ((0, Mp - B), (0, Kp - K)))
    wp = jnp.pad(fw.astype(jnp.float32), ((0, 0), (0, Kp - K)))
    bb = fb.astype(jnp.float32).reshape(1, 1)

    out = pl.pallas_call(
        _fc_sigmoid_kernel,
        out_shape=jax.ShapeDtypeStruct((Mp, 1), jnp.float32),
        grid_spec=pltpu.PrefetchScalarGridSpec(
            num_scalar_prefetch=0,
            grid=(Kp // tk,),
            in_specs=[
                pl.BlockSpec((Mp, tk), lambda k: (0, k)),
                pl.BlockSpec((1, tk), lambda k: (0, k)),
                pl.BlockSpec((1, 1), lambda k: (0, 0)),
            ],
            out_specs=pl.BlockSpec((Mp, 1), lambda k: (0, 0)),
        ),
        compiler_params=pltpu.CompilerParams(dimension_semantics=("arbitrary",)),
    )(xp, wp, bb)
    return out[:B]


# ---------------------------------------------------------------------------
# JAX glue: NHWC im2col + conv wrapper + forward
# ---------------------------------------------------------------------------
def im2col_nhwc(x, kh, kw, stride, pad):
    """x: (N, H, W, C) -> patches (N*OH*OW, kh*kw*C), plus OH, OW."""
    n, h, w, c = x.shape
    xp = jnp.pad(x, ((0, 0), (pad, pad), (pad, pad), (0, 0)))
    oh = (h + 2 * pad - kh) // stride + 1
    ow = (w + 2 * pad - kw) // stride + 1
    cols = []
    for i in range(kh):
        for j in range(kw):
            cols.append(
                xp[:, i:i + stride * oh:stride, j:j + stride * ow:stride, :]
            )
    p = jnp.stack(cols, axis=3)                 # (N, OH, OW, kh*kw, C)
    p = p.reshape(n * oh * ow, kh * kw * c)     # rows (n,oh,ow), cols (kh,kw,c)
    return p, oh, ow


def conv2d_relu_nhwc(x, wmat, bias, oc, k, stride, pad):
    """NHWC in/out. wmat: (Kp, Np) bf16 GEMM weight, bias: (1, Np) f32."""
    n = x.shape[0]
    a, oh, ow = im2col_nhwc(x, k, k, stride, pad)
    out = gemm_bias_act(a, wmat, bias, "relu", out_dtype=jnp.bfloat16)
    return out[: n * oh * ow, :oc].reshape(n, oh, ow, oc)


_CONV_CFG = (
    ("conv1", 64, 4, 2, 1),
    ("conv2", 128, 4, 2, 1),
    ("conv3", 256, 3, 2, 1),
)


def init_params(key, input_channels, image_size):
    """PyTorch-default-style init; weights pre-converted to GEMM layout once."""
    ks = jax.random.split(key, 8)

    def conv_init(kw_key, kb_key, oc, c, k):
        fan_in = c * k * k
        bound = 1.0 / (fan_in ** 0.5)
        w = jax.random.uniform(kw_key, (oc, c, k, k), jnp.float32, -bound, bound)
        b = jax.random.uniform(kb_key, (oc,), jnp.float32, -bound, bound)
        # GEMM layout: K ordered (kh, kw, c) to match NHWC im2col columns.
        wmat = jnp.transpose(w, (2, 3, 1, 0)).reshape(k * k * c, oc)
        K, N = wmat.shape
        Kp = _round_up(K, 128)
        Np = _round_up(N, 128)
        wmat = jnp.pad(wmat, ((0, Kp - K), (0, Np - N))).astype(jnp.bfloat16)
        bias = jnp.pad(b.reshape(1, oc), ((0, 0), (0, Np - N)))
        return wmat, bias

    cin = (input_channels, 64, 128)
    params = {}
    for idx, (name, oc, k, _, _) in enumerate(_CONV_CFG):
        params[name] = conv_init(ks[2 * idx], ks[2 * idx + 1], oc, cin[idx], k)

    fc_in = (image_size // 8) * (image_size // 8) * 256
    bound = 1.0 / (fc_in ** 0.5)
    fw = jax.random.uniform(ks[6], (1, fc_in), jnp.float32, -bound, bound)
    fb = jax.random.uniform(ks[7], (1, 1), jnp.float32, -bound, bound)
    params["fc"] = (fw, fb)
    return params


def discriminator_forward(params, x):
    """x: (N, C, H, W) NCHW like the PyTorch module; returns (N, 1) in [0,1]."""
    x = jnp.transpose(x, (0, 2, 3, 1)).astype(jnp.bfloat16)     # NHWC once
    for name, oc, k, stride, pad in _CONV_CFG:
        wmat, bias = params[name]
        x = conv2d_relu_nhwc(x, wmat, bias, oc, k, stride, pad)
    n = x.shape[0]
    # torch x.view(N, -1) flattens NCHW (channel-major); convert at boundary.
    x = jnp.transpose(x, (0, 3, 1, 2)).reshape(n, -1)
    fw, fb = params["fc"]
    return fc_sigmoid(x, fw, fb)


if __name__ == "__main__":
    key = jax.random.PRNGKey(0)
    kp, kx = jax.random.split(key)
    batch, input_channels, image_size = 2, 4, 16
    params = init_params(kp, input_channels, image_size)
    x = jax.random.normal(
        kx, (batch, input_channels, image_size, image_size), jnp.float32
    )
    fwd = jax.jit(discriminator_forward)
    out = jax.block_until_ready(fwd(params, x))
    assert out.shape == (batch, 1)
    assert bool(jnp.all((out >= 0.0) & (out <= 1.0)))
    print("KERNEL_OK")
</pallas_src>

<mosaic_0001>
module attributes {stable_mosaic.version = 11 : i64} {
  func.func @_gemm_bias_act_kernel(%arg0: i32, %arg1: i32, %arg2: i32, %arg3: memref<128x128xbf16, #tpu.memory_space<vmem>>, %arg4: memref<128x128xbf16, #tpu.memory_space<vmem>>, %arg5: memref<1x128xf32, #tpu.memory_space<vmem>>, %arg6: memref<128x128xbf16, #tpu.memory_space<vmem>>, %arg7: memref<128x128xf32, #tpu.memory_space<vmem>>) attributes {dimension_semantics = [#tpu.dimension_semantics<parallel>, #tpu.dimension_semantics<parallel>, #tpu.dimension_semantics<arbitrary>], iteration_bounds = array<i64: 1, 1, 1>, scalar_prefetch = 0 : i64, scratch_operands = 1 : i64, tpu.core_type = #tpu.core_type<tc>, window_params = [{transform_indices = @transform_0, window_bounds = array<i64: 128, 128>}, {transform_indices = @transform_1, window_bounds = array<i64: 128, 128>}, {transform_indices = @transform_2, window_bounds = array<i64: 1, 128>}, {transform_indices = @transform_3, window_bounds = array<i64: 128, 128>}]} {
    %c0_i32 = arith.constant 0 : i32
    %0 = arith.cmpi eq, %arg2, %c0_i32 : i32
    %1 = arith.extui %0 : i1 to i32
    %c0_i32_0 = arith.constant 0 : i32
    %2 = arith.cmpi ne, %1, %c0_i32_0 : i32
    scf.if %2 {
      %cst_10 = arith.constant 0.000000e+00 : f32
      %12 = vector.broadcast %cst_10 : f32 to vector<128x128xf32>
      %c0_11 = arith.constant 0 : index
      %c0_12 = arith.constant 0 : index
      %13 = vector.load %arg7[%c0_11, %c0_12] : memref<128x128xf32, #tpu.memory_space<vmem>>, vector<128x128xf32>
      tpu.vector_store %arg7[%c0_11, %c0_12], %12 {strides = array<i32>} : memref<128x128xf32, #tpu.memory_space<vmem>>, vector<128x128xf32>,
    } else {
    }
    %c0 = arith.constant 0 : index
    %c0_1 = arith.constant 0 : index
    %3 = vector.load %arg7[%c0, %c0_1] : memref<128x128xf32, #tpu.memory_space<vmem>>, vector<128x128xf32>
    %c0_2 = arith.constant 0 : index
    %c0_3 = arith.constant 0 : index
    %4 = vector.load %arg3[%c0_2, %c0_3] : memref<128x128xbf16, #tpu.memory_space<vmem>>, vector<128x128xbf16>
    %c0_4 = arith.constant 0 : index
    %c0_5 = arith.constant 0 : index
    %5 = vector.load %arg4[%c0_4, %c0_5] : memref<128x128xbf16, #tpu.memory_space<vmem>>, vector<128x128xbf16>
    %cst = arith.constant dense<0.000000e+00> : vector<128x128xf32>
    %6 = tpu.matmul %4, %5, %cst {dimension_numbers = #tpu.dot_dimension_numbers<[1], [0], [0], [1], [0, 0, 1, 1], [], []>} : vector<128x128xbf16>, vector<128x128xbf16>, vector<128x128xf32> -> vector<128x128xf32>
    %7 = arith.addf %3, %6 : vector<128x128xf32>
    %c0_6 = arith.constant 0 : index
    %c0_7 = arith.constant 0 : index
    %8 = vector.load %arg7[%c0_6, %c0_7] : memref<128x128xf32, #tpu.memory_space<vmem>>, vector<128x128xf32>
    tpu.vector_store %arg7[%c0_6, %c0_7], %7 {strides = array<i32>} : memref<128x128xf32, #tpu.memory_space<vmem>>, vector<128x128xf32>,
    %c0_i32_8 = arith.constant 0 : i32
    %9 = arith.cmpi eq, %arg2, %c0_i32_8 : i32
    %10 = arith.extui %9 : i1 to i32
    %c0_i32_9 = arith.constant 0 : i32
    %11 = arith.cmpi ne, %10, %c0_i32_9 : i32
    scf.if %11 {
      %c0_10 = arith.constant 0 : index
      %c0_11 = arith.constant 0 : index
      %12 = vector.load %arg7[%c0_10, %c0_11] : memref<128x128xf32, #tpu.memory_space<vmem>>, vector<128x128xf32>
      %c0_12 = arith.constant 0 : index
      %c0_13 = arith.constant 0 : index
      %13 = vector.load %arg5[%c0_12, %c0_13] : memref<1x128xf32, #tpu.memory_space<vmem>>, vector<1x128xf32>
      %14 = vector.broadcast %13 : vector<1x128xf32> to vector<128x128xf32>
      %15 = arith.addf %12, %14 : vector<128x128xf32>
      %cst_14 = arith.constant 0.000000e+00 : f32
      %16 = vector.broadcast %cst_14 : f32 to vector<128x128xf32>
      %17 = arith.maximumf %15, %16 : vector<128x128xf32>
      %18 = arith.truncf %17 : vector<128x128xf32> to vector<128x128xbf16>
      %c0_15 = arith.constant 0 : index
      %c0_16 = arith.constant 0 : index
      %19 = vector.load %arg6[%c0_15, %c0_16] : memref<128x128xbf16, #tpu.memory_space<vmem>>, vector<128x128xbf16>
      tpu.vector_store %arg6[%c0_15, %c0_16], %18 {strides = array<i32>} : memref<128x128xbf16, #tpu.memory_space<vmem>>, vector<128x128xbf16>,
    } else {
    }
    return
  }
  func.func @transform_0(%arg0: i32, %arg1: i32, %arg2: i32) -> (i32, i32) {
    %c0_i32 = arith.constant 0 : i32
    return %arg0, %arg2 : i32, i32
  }
  func.func @transform_1(%arg0: i32, %arg1: i32, %arg2: i32) -> (i32, i32) {
    %c0_i32 = arith.constant 0 : i32
    return %arg2, %arg1 : i32, i32
  }
  func.func @transform_2(%arg0: i32, %arg1: i32, %arg2: i32) -> (i32, i32) {
    %c0_i32 = arith.constant 0 : i32
    %c0_i32_0 = arith.constant 0 : i32
    return %c0_i32, %arg1 : i32, i32
  }
  func.func @transform_3(%arg0: i32, %arg1: i32, %arg2: i32) -> (i32, i32) {
    %c0_i32 = arith.constant 0 : i32
    return %arg0, %arg1 : i32, i32
  }
}

module attributes {stable_mosaic.version = 11 : i64} {
  func.func @_gemm_bias_act_kernel(%arg0: i32, %arg1: i32, %arg2: i32, %arg3: memref<32x512xbf16, #tpu.memory_space<vmem>>, %arg4: memref<512x128xbf16, #tpu.memory_space<vmem>>, %arg5: memref<1x128xf32, #tpu.memory_space<vmem>>, %arg6: memref<32x128xbf16, #tpu.memory_space<vmem>>, %arg7: memref<32x128xf32, #tpu.memory_space<vmem>>) attributes {dimension_semantics = [#tpu.dimension_semantics<parallel>, #tpu.dimension_semantics<parallel>, #tpu.dimension_semantics<arbitrary>], iteration_bounds = array<i64: 1, 1, 2>, scalar_prefetch = 0 : i64, scratch_operands = 1 : i64, tpu.core_type = #tpu.core_type<tc>, window_params = [{transform_indices = @transform_0, window_bounds = array<i64: 32, 512>}, {transform_indices = @transform_1, window_bounds = array<i64: 512, 128>}, {transform_indices = @transform_2, window_bounds = array<i64: 1, 128>}, {transform_indices = @transform_3, window_bounds = array<i64: 32, 128>}]} {
    %c0_i32 = arith.constant 0 : i32
    %0 = arith.cmpi eq, %arg2, %c0_i32 : i32
    %1 = arith.extui %0 : i1 to i32
    %c0_i32_0 = arith.constant 0 : i32
    %2 = arith.cmpi ne, %1, %c0_i32_0 : i32
    scf.if %2 {
      %cst_9 = arith.constant 0.000000e+00 : f32
      %12 = vector.broadcast %cst_9 : f32 to vector<32x128xf32>
      %c0_10 = arith.constant 0 : index
      %c0_11 = arith.constant 0 : index
      %13 = vector.load %arg7[%c0_10, %c0_11] : memref<32x128xf32, #tpu.memory_space<vmem>>, vector<32x128xf32>
      tpu.vector_store %arg7[%c0_10, %c0_11], %12 {strides = array<i32>} : memref<32x128xf32, #tpu.memory_space<vmem>>, vector<32x128xf32>,
    } else {
    }
    %c0 = arith.constant 0 : index
    %c0_1 = arith.constant 0 : index
    %3 = vector.load %arg7[%c0, %c0_1] : memref<32x128xf32, #tpu.memory_space<vmem>>, vector<32x128xf32>
    %c0_2 = arith.constant 0 : index
    %c0_3 = arith.constant 0 : index
    %4 = vector.load %arg3[%c0_2, %c0_3] : memref<32x512xbf16, #tpu.memory_space<vmem>>, vector<32x512xbf16>
    %c0_4 = arith.constant 0 : index
    %c0_5 = arith.constant 0 : index
    %5 = vector.load %arg4[%c0_4, %c0_5] : memref<512x128xbf16, #tpu.memory_space<vmem>>, vector<512x128xbf16>
    %cst = arith.constant dense<0.000000e+00> : vector<32x128xf32>
    %6 = tpu.matmul %4, %5, %cst {dimension_numbers = #tpu.dot_dimension_numbers<[1], [0], [0], [1], [0, 0, 1, 1], [], []>} : vector<32x512xbf16>, vector<512x128xbf16>, vector<32x128xf32> -> vector<32x128xf32>
    %7 = arith.addf %3, %6 : vector<32x128xf32>
    %c0_6 = arith.constant 0 : index
    %c0_7 = arith.constant 0 : index
    %8 = vector.load %arg7[%c0_6, %c0_7] : memref<32x128xf32, #tpu.memory_space<vmem>>, vector<32x128xf32>
    tpu.vector_store %arg7[%c0_6, %c0_7], %7 {strides = array<i32>} : memref<32x128xf32, #tpu.memory_space<vmem>>, vector<32x128xf32>,
    %c1_i32 = arith.constant 1 : i32
    %9 = arith.cmpi eq, %arg2, %c1_i32 : i32
    %10 = arith.extui %9 : i1 to i32
    %c0_i32_8 = arith.constant 0 : i32
    %11 = arith.cmpi ne, %10, %c0_i32_8 : i32
    scf.if %11 {
      %c0_9 = arith.constant 0 : index
      %c0_10 = arith.constant 0 : index
      %12 = vector.load %arg7[%c0_9, %c0_10] : memref<32x128xf32, #tpu.memory_space<vmem>>, vector<32x128xf32>
      %c0_11 = arith.constant 0 : index
      %c0_12 = arith.constant 0 : index
      %13 = vector.load %arg5[%c0_11, %c0_12] : memref<1x128xf32, #tpu.memory_space<vmem>>, vector<1x128xf32>
      %14 = vector.broadcast %13 : vector<1x128xf32> to vector<32x128xf32>
      %15 = arith.addf %12, %14 : vector<32x128xf32>
      %cst_13 = arith.constant 0.000000e+00 : f32
      %16 = vector.broadcast %cst_13 : f32 to vector<32x128xf32>
      %17 = arith.maximumf %15, %16 : vector<32x128xf32>
      %18 = arith.truncf %17 : vector<32x128xf32> to vector<32x128xbf16>
      %c0_14 = arith.constant 0 : index
      %c0_15 = arith.constant 0 : index
      %19 = vector.load %arg6[%c0_14, %c0_15] : memref<32x128xbf16, #tpu.memory_space<vmem>>, vector<32x128xbf16>
      tpu.vector_store %arg6[%c0_14, %c0_15], %18 {strides = array<i32>} : memref<32x128xbf16, #tpu.memory_space<vmem>>, vector<32x128xbf16>,
    } else {
    }
    return
  }
  func.func @transform_0(%arg0: i32, %arg1: i32, %arg2: i32) -> (i32, i32) {
    %c0_i32 = arith.constant 0 : i32
    return %arg0, %arg2 : i32, i32
  }
  func.func @transform_1(%arg0: i32, %arg1: i32, %arg2: i32) -> (i32, i32) {
    %c0_i32 = arith.constant 0 : i32
    return %arg2, %arg1 : i32, i32
  }
  func.func @transform_2(%arg0: i32, %arg1: i32, %arg2: i32) -> (i32, i32) {
    %c0_i32 = arith.constant 0 : i32
    %c0_i32_0 = arith.constant 0 : i32
    return %c0_i32, %arg1 : i32, i32
  }
  func.func @transform_3(%arg0: i32, %arg1: i32, %arg2: i32) -> (i32, i32) {
    %c0_i32 = arith.constant 0 : i32
    return %arg0, %arg1 : i32, i32
  }
}

module attributes {stable_mosaic.version = 11 : i64} {
  func.func @_gemm_bias_act_kernel(%arg0: i32, %arg1: i32, %arg2: i32, %arg3: memref<16x384xbf16, #tpu.memory_space<vmem>>, %arg4: memref<384x256xbf16, #tpu.memory_space<vmem>>, %arg5: memref<1x256xf32, #tpu.memory_space<vmem>>, %arg6: memref<16x256xbf16, #tpu.memory_space<vmem>>, %arg7: memref<16x256xf32, #tpu.memory_space<vmem>>) attributes {dimension_semantics = [#tpu.dimension_semantics<parallel>, #tpu.dimension_semantics<parallel>, #tpu.dimension_semantics<arbitrary>], iteration_bounds = array<i64: 1, 1, 3>, scalar_prefetch = 0 : i64, scratch_operands = 1 : i64, tpu.core_type = #tpu.core_type<tc>, window_params = [{transform_indices = @transform_0, window_bounds = array<i64: 16, 384>}, {transform_indices = @transform_1, window_bounds = array<i64: 384, 256>}, {transform_indices = @transform_2, window_bounds = array<i64: 1, 256>}, {transform_indices = @transform_3, window_bounds = array<i64: 16, 256>}]} {
    %c0_i32 = arith.constant 0 : i32
    %0 = arith.cmpi eq, %arg2, %c0_i32 : i32
    %1 = arith.extui %0 : i1 to i32
    %c0_i32_0 = arith.constant 0 : i32
    %2 = arith.cmpi ne, %1, %c0_i32_0 : i32
    scf.if %2 {
      %cst_9 = arith.constant 0.000000e+00 : f32
      %12 = vector.broadcast %cst_9 : f32 to vector<16x256xf32>
      %c0_10 = arith.constant 0 : index
      %c0_11 = arith.constant 0 : index
      %13 = vector.load %arg7[%c0_10, %c0_11] : memref<16x256xf32, #tpu.memory_space<vmem>>, vector<16x256xf32>
      tpu.vector_store %arg7[%c0_10, %c0_11], %12 {strides = array<i32>} : memref<16x256xf32, #tpu.memory_space<vmem>>, vector<16x256xf32>,
    } else {
    }
    %c0 = arith.constant 0 : index
    %c0_1 = arith.constant 0 : index
    %3 = vector.load %arg7[%c0, %c0_1] : memref<16x256xf32, #tpu.memory_space<vmem>>, vector<16x256xf32>
    %c0_2 = arith.constant 0 : index
    %c0_3 = arith.constant 0 : index
    %4 = vector.load %arg3[%c0_2, %c0_3] : memref<16x384xbf16, #tpu.memory_space<vmem>>, vector<16x384xbf16>
    %c0_4 = arith.constant 0 : index
    %c0_5 = arith.constant 0 : index
    %5 = vector.load %arg4[%c0_4, %c0_5] : memref<384x256xbf16, #tpu.memory_space<vmem>>, vector<384x256xbf16>
    %cst = arith.constant dense<0.000000e+00> : vector<16x256xf32>
    %6 = tpu.matmul %4, %5, %cst {dimension_numbers = #tpu.dot_dimension_numbers<[1], [0], [0], [1], [0, 0, 1, 1], [], []>} : vector<16x384xbf16>, vector<384x256xbf16>, vector<16x256xf32> -> vector<16x256xf32>
    %7 = arith.addf %3, %6 : vector<16x256xf32>
    %c0_6 = arith.constant 0 : index
    %c0_7 = arith.constant 0 : index
    %8 = vector.load %arg7[%c0_6, %c0_7] : memref<16x256xf32, #tpu.memory_space<vmem>>, vector<16x256xf32>
    tpu.vector_store %arg7[%c0_6, %c0_7], %7 {strides = array<i32>} : memref<16x256xf32, #tpu.memory_space<vmem>>, vector<16x256xf32>,
    %c2_i32 = arith.constant 2 : i32
    %9 = arith.cmpi eq, %arg2, %c2_i32 : i32
    %10 = arith.extui %9 : i1 to i32
    %c0_i32_8 = arith.constant 0 : i32
    %11 = arith.cmpi ne, %10, %c0_i32_8 : i32
    scf.if %11 {
      %c0_9 = arith.constant 0 : index
      %c0_10 = arith.constant 0 : index
      %12 = vector.load %arg7[%c0_9, %c0_10] : memref<16x256xf32, #tpu.memory_space<vmem>>, vector<16x256xf32>
      %c0_11 = arith.constant 0 : index
      %c0_12 = arith.constant 0 : index
      %13 = vector.load %arg5[%c0_11, %c0_12] : memref<1x256xf32, #tpu.memory_space<vmem>>, vector<1x256xf32>
      %14 = vector.broadcast %13 : vector<1x256xf32> to vector<16x256xf32>
      %15 = arith.addf %12, %14 : vector<16x256xf32>
      %cst_13 = arith.constant 0.000000e+00 : f32
      %16 = vector.broadcast %cst_13 : f32 to vector<16x256xf32>
      %17 = arith.maximumf %15, %16 : vector<16x256xf32>
      %18 = arith.truncf %17 : vector<16x256xf32> to vector<16x256xbf16>
      %c0_14 = arith.constant 0 : index
      %c0_15 = arith.constant 0 : index
      %19 = vector.load %arg6[%c0_14, %c0_15] : memref<16x256xbf16, #tpu.memory_space<vmem>>, vector<16x256xbf16>
      tpu.vector_store %arg6[%c0_14, %c0_15], %18 {strides = array<i32>} : memref<16x256xbf16, #tpu.memory_space<vmem>>, vector<16x256xbf16>,
    } else {
    }
    return
  }
  func.func @transform_0(%arg0: i32, %arg1: i32, %arg2: i32) -> (i32, i32) {
    %c0_i32 = arith.constant 0 : i32
    return %arg0, %arg2 : i32, i32
  }
  func.func @transform_1(%arg0: i32, %arg1: i32, %arg2: i32) -> (i32, i32) {
    %c0_i32 = arith.constant 0 : i32
    return %arg2, %arg1 : i32, i32
  }
  func.func @transform_2(%arg0: i32, %arg1: i32, %arg2: i32) -> (i32, i32) {
    %c0_i32 = arith.constant 0 : i32
    %c0_i32_0 = arith.constant 0 : i32
    return %c0_i32, %arg1 : i32, i32
  }
  func.func @transform_3(%arg0: i32, %arg1: i32, %arg2: i32) -> (i32, i32) {
    %c0_i32 = arith.constant 0 : i32
    return %arg0, %arg1 : i32, i32
  }
}

module attributes {stable_mosaic.version = 11 : i64} {
  func.func @_fc_sigmoid_kernel(%arg0: i32, %arg1: memref<8x512xf32, #tpu.memory_space<vmem>>, %arg2: memref<1x512xf32, #tpu.memory_space<vmem>>, %arg3: memref<1x1xf32, #tpu.memory_space<vmem>>, %arg4: memref<8x1xf32, #tpu.memory_space<vmem>>) attributes {dimension_semantics = [#tpu.dimension_semantics<arbitrary>], iteration_bounds = array<i64: 2>, scalar_prefetch = 0 : i64, scratch_operands = 0 : i64, tpu.core_type = #tpu.core_type<tc>, window_params = [{transform_indices = @transform_0, window_bounds = array<i64: 8, 512>}, {transform_indices = @transform_1, window_bounds = array<i64: 1, 512>}, {pipeline_mode = #tpu.pipeline_mode<synchronous>, transform_indices = @transform_2, window_bounds = array<i64: 1, 1>}, {pipeline_mode = #tpu.pipeline_mode<synchronous>, transform_indices = @transform_3, window_bounds = array<i64: 8, 1>}]} {
    %c0_i32 = arith.constant 0 : i32
    %0 = arith.cmpi eq, %arg0, %c0_i32 : i32
    %1 = arith.extui %0 : i1 to i32
    %c0_i32_0 = arith.constant 0 : i32
    %2 = arith.cmpi ne, %1, %c0_i32_0 : i32
    scf.if %2 {
      %cst_9 = arith.constant 0.000000e+00 : f32
      %15 = vector.broadcast %cst_9 : f32 to vector<8x1xf32>
      %c0_10 = arith.constant 0 : index
      %c0_11 = arith.constant 0 : index
      %16 = vector.load %arg4[%c0_10, %c0_11] : memref<8x1xf32, #tpu.memory_space<vmem>>, vector<8x1xf32>
      tpu.vector_store %arg4[%c0_10, %c0_11], %15 {strides = array<i32>} : memref<8x1xf32, #tpu.memory_space<vmem>>, vector<8x1xf32>,
    } else {
    }
    %c0 = arith.constant 0 : index
    %c0_1 = arith.constant 0 : index
    %3 = vector.load %arg4[%c0, %c0_1] : memref<8x1xf32, #tpu.memory_space<vmem>>, vector<8x1xf32>
    %c0_2 = arith.constant 0 : index
    %c0_3 = arith.constant 0 : index
    %4 = vector.load %arg1[%c0_2, %c0_3] : memref<8x512xf32, #tpu.memory_space<vmem>>, vector<8x512xf32>
    %c0_4 = arith.constant 0 : index
    %c0_5 = arith.constant 0 : index
    %5 = vector.load %arg2[%c0_4, %c0_5] : memref<1x512xf32, #tpu.memory_space<vmem>>, vector<1x512xf32>
    %6 = vector.broadcast %5 : vector<1x512xf32> to vector<8x512xf32>
    %7 = arith.mulf %4, %6 : vector<8x512xf32>
    %cst = arith.constant dense<0.000000e+00> : vector<8xf32>
    %8 = vector.multi_reduction <add>, %7, %cst [1] : vector<8x512xf32> to vector<8xf32>
    %9 = vector.shape_cast %8 : vector<8xf32> to vector<8x1xf32>
    %10 = arith.addf %3, %9 : vector<8x1xf32>
    %c0_6 = arith.constant 0 : index
    %c0_7 = arith.constant 0 : index
    %11 = vector.load %arg4[%c0_6, %c0_7] : memref<8x1xf32, #tpu.memory_space<vmem>>, vector<8x1xf32>
    tpu.vector_store %arg4[%c0_6, %c0_7], %10 {strides = array<i32>} : memref<8x1xf32, #tpu.memory_space<vmem>>, vector<8x1xf32>,
    %c1_i32 = arith.constant 1 : i32
    %12 = arith.cmpi eq, %arg0, %c1_i32 : i32
    %13 = arith.extui %12 : i1 to i32
    %c0_i32_8 = arith.constant 0 : i32
    %14 = arith.cmpi ne, %13, %c0_i32_8 : i32
    scf.if %14 {
      %c0_9 = arith.constant 0 : index
      %c0_10 = arith.constant 0 : index
      %15 = vector.load %arg4[%c0_9, %c0_10] : memref<8x1xf32, #tpu.memory_space<vmem>>, vector<8x1xf32>
      %c0_11 = arith.constant 0 : index
      %c0_12 = arith.constant 0 : index
      %16 = vector.load %arg3[%c0_11, %c0_12] : memref<1x1xf32, #tpu.memory_space<vmem>>, vector<1x1xf32>
      %17 = vector.broadcast %16 : vector<1x1xf32> to vector<8x1xf32>
      %18 = arith.addf %15, %17 : vector<8x1xf32>
      %19 = arith.negf %18 : vector<8x1xf32>
      %20 = math.exp %19 : vector<8x1xf32>
      %cst_13 = arith.constant 1.000000e+00 : f32
      %21 = vector.broadcast %cst_13 : f32 to vector<8x1xf32>
      %22 = arith.addf %21, %20 : vector<8x1xf32>
      %23 = arith.divf %21, %22 : vector<8x1xf32>
      %c0_14 = arith.constant 0 : index
      %c0_15 = arith.constant 0 : index
      %24 = vector.load %arg4[%c0_14, %c0_15] : memref<8x1xf32, #tpu.memory_space<vmem>>, vector<8x1xf32>
      tpu.vector_store %arg4[%c0_14, %c0_15], %23 {strides = array<i32>} : memref<8x1xf32, #tpu.memory_space<vmem>>, vector<8x1xf32>,
    } else {
    }
    return
  }
  func.func @transform_0(%arg0: i32) -> (i32, i32) {
    %c0_i32 = arith.constant 0 : i32
    %c0_i32_0 = arith.constant 0 : i32
    return %c0_i32, %arg0 : i32, i32
  }
  func.func @transform_1(%arg0: i32) -> (i32, i32) {
    %c0_i32 = arith.constant 0 : i32
    %c0_i32_0 = arith.constant 0 : i32
    return %c0_i32, %arg0 : i32, i32
  }
  func.func @transform_2(%arg0: i32) -> (i32, i32) {
    %c0_i32 = arith.constant 0 : i32
    %c0_i32_0 = arith.constant 0 : i32
    %c0_i32_1 = arith.constant 0 : i32
    return %c0_i32, %c0_i32_0 : i32, i32
  }
  func.func @transform_3(%arg0: i32) -> (i32, i32) {
    %c0_i32 = arith.constant 0 : i32
    %c0_i32_0 = arith.constant 0 : i32
    %c0_i32_1 = arith.constant 0 : i32
    return %c0_i32, %c0_i32_0 : i32, i32
  }
}

</mosaic_0001>

<bundles_post_ra>
// kernel: discriminator_forward.4
= control target key start
LH: loop header
LB: loop body
LE: loop exit
PB: predicated region body
PF: predicated region fallthrough
CT: control target
= control target key end

     0   :  { %s597_s1 = inlined_call_operand.vmem [shape: bf16[128,128], index: 1, kind: input, shape index: {}]   ;;  %s598_s2 = inlined_call_operand.vmem [shape: f32[1,128], index: 2, kind: input, shape index: {}]   ;;  %s599_s0 = inlined_call_operand.vmem [shape: bf16[128,128], index: 0, kind: input, shape index: {}]   ;;  %s600_s3 = inlined_call_operand.vmem [shape: bf16[128,128], index: 3, kind: output, shape index: {}]  }
   0x1   :  { %v429_v0 = vld [vmem:[%s597_s1 + $0x38] sm:$0xff]  ;;  %v428_v1 = vld [vmem:[%s597_s1 + $0x30] sm:$0xff]  ;;  %v427_v2 = vld [vmem:[%s597_s1 + $0x28] sm:$0xff] }
   0x2   :  { %178 = vmatpush.bf16.msra.mxu0 %v429_v0  ;;  %477 = vmatpush.bf16.msra.mxu1 %v429_v0  ;;  %v426_v3 = vld [vmem:[%s597_s1 + $0x20] sm:$0xff]  ;;  %v425_v4 = vld [vmem:[%s597_s1 + $0x18] sm:$0xff]  ;;  %v424_v5 = vld [vmem:[%s597_s1 + $0x10] sm:$0xff] }
   0x3   :  { %478 = vmatpush.bf16.msra.mxu2 %v429_v0  ;;  %479 = vmatpush.bf16.msra.mxu3 %v429_v0  ;;  %v423_v6 = vld [vmem:[%s597_s1 + $0x8] sm:$0xff]  ;;  %v422_v7 = vld [vmem:[%s597_s1] sm:$0xff]  ;;  %v416_v9 = vld [vmem:[%s599_s0 + $0x10] sm:$0xff] }
   0x4   :  { %v414_v8 = vld [vmem:[%s599_s0] sm:$0xff]  ;;  %v420_v11 = vld [vmem:[%s599_s0 + $0x30] sm:$0xff]  ;;  %v415_v12 = vld [vmem:[%s599_s0 + $0x8] sm:$0xff] }
   0x5   :  { %v418_v10 = vld [vmem:[%s599_s0 + $0x20] sm:$0xff]  ;;  %v417_v13 = vld [vmem:[%s599_s0 + $0x18] sm:$0xff]  ;;  %v419_v14 = vld [vmem:[%s599_s0 + $0x28] sm:$0xff] }
   0x6   :  { %179 = vmatpush.bf16.msra.mxu0 %v428_v1  ;;  %480 = vmatpush.bf16.msra.mxu1 %v428_v1  ;;  %v421_v15 = vld [vmem:[%s599_s0 + $0x38] sm:$0xff]  ;;  %v501_v18 = vld [vmem:[%s598_s2] ss:$0 sm:$0xff] }
   0x7   :  { %481 = vmatpush.bf16.msra.mxu2 %v428_v1  ;;  %482 = vmatpush.bf16.msra.mxu3 %v428_v1 }
   0xa   :  { %180 = vmatpush.bf16.msra.mxu0 %v427_v2  ;;  %483 = vmatpush.bf16.msra.mxu1 %v427_v2 }
   0xb   :  { %484 = vmatpush.bf16.msra.mxu2 %v427_v2  ;;  %485 = vmatpush.bf16.msra.mxu3 %v427_v2 }
   0xe   :  { %181 = vmatpush.bf16.msra.mxu0 %v426_v3  ;;  %486 = vmatpush.bf16.msra.mxu1 %v426_v3 }
   0xf   :  { %487 = vmatpush.bf16.msra.mxu2 %v426_v3  ;;  %488 = vmatpush.bf16.msra.mxu3 %v426_v3 }
  0x12   :  { %182 = vmatpush.bf16.msra.mxu0 %v425_v4  ;;  %489 = vmatpush.bf16.msra.mxu1 %v425_v4 }
  0x13   :  { %490 = vmatpush.bf16.msra.mxu2 %v425_v4  ;;  %491 = vmatpush.bf16.msra.mxu3 %v425_v4 }
  0x16   :  { %183 = vmatpush.bf16.msra.mxu0 %v424_v5  ;;  %492 = vmatpush.bf16.msra.mxu1 %v424_v5 }
  0x17   :  { %493 = vmatpush.bf16.msra.mxu2 %v424_v5  ;;  %494 = vmatpush.bf16.msra.mxu3 %v424_v5 }
  0x1a   :  { %184 = vmatpush.bf16.msra.mxu0 %v423_v6  ;;  %495 = vmatpush.bf16.msra.mxu1 %v423_v6 }
  0x1b   :  { %496 = vmatpush.bf16.msra.mxu2 %v423_v6  ;;  %497 = vmatpush.bf16.msra.mxu3 %v423_v6 }
  0x1e   :  { %185 = vmatpush.bf16.msra.mxu0 %v422_v7  ;;  %498 = vmatpush.bf16.msra.mxu1 %v422_v7 }
  0x1f   :  { %499 = vmatpush.bf16.msra.mxu2 %v422_v7  ;;  %500 = vmatpush.bf16.msra.mxu3 %v422_v7 }
  0x21   :  { %186 = vmatmul.bf16.vlgmr.msra.gmra.mxu0 %v414_v8  ;;  %196 = vmatmul.bf16.vlgmr.msra.gmra.mxu1 %v416_v9 }
  0x22   :  { %206 = vmatmul.bf16.vlgmr.msra.gmra.mxu2 %v418_v10  ;;  %216 = vmatmul.bf16.vlgmr.msra.gmra.mxu3 %v420_v11 }
  0x31   :  { %191 = vmatmul.bf16.gmra.mxu0 %v415_v12  ;;  %201 = vmatmul.bf16.gmra.mxu1 %v417_v13 }
  0x32   :  { %211 = vmatmul.bf16.gmra.mxu2 %v419_v14  ;;  %221 = vmatmul.bf16.gmra.mxu3 %v421_v15 }
  0x9e   :  { %v187_v16 = vpop.f32.mrf.mxu0  ;;  %v197_v17 = vpop.f32.mrf.mxu1 }
  0x9f   :  { %v282_v19 = vadd.f32 %v501_v18, %v187_v16  ;;  %v286_v20 = vadd.f32 %v501_v18, %v197_v17 }
  0xa1   :  { %v298_v27 = vmax.f32 %v282_v19, 0.0  ;;  %v302_v28 = vmax.f32 %v286_v20, 0.0 }
  0xa5   :  { %v207_v21 = vpop.f32.mrf.mxu2  ;;  %v217_v22 = vpop.f32.mrf.mxu3 }
  0xa6   :  { %v189_v23 = vpop.f32.mrf.mxu0  ;;  %v199_v24 = vpop.f32.mrf.mxu1  ;;  %v290_v33 = vadd.f32 %v501_v18, %v207_v21  ;;  %v294_v34 = vadd.f32 %v501_v18, %v217_v22 }
  0xa7   :  { %v283_v25 = vadd.f32 %v501_v18, %v189_v23  ;;  %v287_v26 = vadd.f32 %v501_v18, %v199_v24 }
  0xa8   :  { %v306_v41 = vmax.f32 %v290_v33, 0.0  ;;  %v310_v42 = vmax.f32 %v294_v34, 0.0 }
  0xa9   :  { %v299_v29 = vmax.f32 %v283_v25, 0.0  ;;  %v303_v30 = vmax.f32 %v287_v26, 0.0 }
  0xab   :  { %v433_v31 = vpack.c.bf16 %v299_v29, %v298_v27  ;;  %v443_v32 = vpack.c.bf16 %v303_v30, %v302_v28 }
  0xad   :  { %434 = vst [vmem:[%s600_s3] sm:$0xff] %v433_v31   ;;  %v209_v35 = vpop.f32.mrf.mxu2  ;;  %v219_v36 = vpop.f32.mrf.mxu3 }
  0xae   :  { %471 = vst [vmem:[%s600_s3 + $0x10] sm:$0xff] %v443_v32   ;;  %v291_v37 = vadd.f32 %v501_v18, %v209_v35  ;;  %v295_v38 = vadd.f32 %v501_v18, %v219_v36  ;;  %v192_v39 = vpop.f32.mrf.mxu0  ;;  %v202_v40 = vpop.f32.mrf.mxu1 }
  0xaf   :  { %v284_v47 = vadd.f32 %v501_v18, %v192_v39  ;;  %v288_v48 = vadd.f32 %v501_v18, %v202_v40 }
  0xb0   :  { %v307_v43 = vmax.f32 %v291_v37, 0.0  ;;  %v311_v44 = vmax.f32 %v295_v38, 0.0 }
  0xb1   :  { %v300_v55 = vmax.f32 %v284_v47, 0.0  ;;  %v304_v56 = vmax.f32 %v288_v48, 0.0 }
  0xb2   :  { %v453_v45 = vpack.c.bf16 %v307_v43, %v306_v41  ;;  %v463_v46 = vpack.c.bf16 %v311_v44, %v310_v42 }
  0xb4   :  { %473 = vst [vmem:[%s600_s3 + $0x20] sm:$0xff] %v453_v45  }
  0xb5   :  { %475 = vst [vmem:[%s600_s3 + $0x30] sm:$0xff] %v463_v46   ;;  %v212_v49 = vpop.f32.mrf.mxu2  ;;  %v222_v50 = vpop.f32.mrf.mxu3 }
  0xb6   :  { %v194_v51 = vpop.f32.mrf.mxu0  ;;  %v204_v52 = vpop.f32.mrf.mxu1  ;;  %v292_v61 = vadd.f32 %v501_v18, %v212_v49  ;;  %v296_v62 = vadd.f32 %v501_v18, %v222_v50 }
  0xb7   :  { %v285_v53 = vadd.f32 %v501_v18, %v194_v51  ;;  %v289_v54 = vadd.f32 %v501_v18, %v204_v52 }
  0xb8   :  { %v308_v3 = vmax.f32 %v292_v61, 0.0  ;;  %v312_v4 = vmax.f32 %v296_v62, 0.0 }
  0xb9   :  { %v301_v57 = vmax.f32 %v285_v53, 0.0  ;;  %v305_v58 = vmax.f32 %v289_v54, 0.0 }
  0xbb   :  { %v438_v59 = vpack.c.bf16 %v301_v57, %v300_v55  ;;  %v448_v60 = vpack.c.bf16 %v305_v58, %v304_v56 }
  0xbd   :  { %470 = vst [vmem:[%s600_s3 + $0x8] sm:$0xff] %v438_v59   ;;  %v214_v63 = vpop.f32.mrf.mxu2  ;;  %v224_v0 = vpop.f32.mrf.mxu3 }
  0xbe   :  { %472 = vst [vmem:[%s600_s3 + $0x18] sm:$0xff] %v448_v60   ;;  %v293_v1 = vadd.f32 %v501_v18, %v214_v63  ;;  %v297_v2 = vadd.f32 %v501_v18, %v224_v0 }
  0xc0   :  { %v309_v5 = vmax.f32 %v293_v1, 0.0  ;;  %v313_v6 = vmax.f32 %v297_v2, 0.0 }
  0xc2   :  { %v458_v7 = vpack.c.bf16 %v309_v5, %v308_v3  ;;  %v468_v8 = vpack.c.bf16 %v313_v6, %v312_v4 }
  0xc4   :  { %474 = vst [vmem:[%s600_s3 + $0x28] sm:$0xff] %v458_v7  }
  0xc5   :  { %476 = vst [vmem:[%s600_s3 + $0x38] sm:$0xff] %v468_v8  }

// kernel: discriminator_forward.5
= control target key start
LH: loop header
LB: loop body
LE: loop exit
PB: predicated region body
PF: predicated region fallthrough
CT: control target
= control target key end

     0   :  { %s1158_s12 = smov 0   ;;  %s1160_s13 = smov 0   ;;  %s1286_s0 = inlined_call_operand.vmem [shape: bf16[32,1024], index: 0, kind: input, shape index: {}]   ;;  %s1287_s1 = inlined_call_operand.vmem [shape: bf16[1024,128], index: 1, kind: input, shape index: {}]   ;;  %s1288_s2 = inlined_call_operand.vmem [shape: f32[1,128], index: 2, kind: input, shape index: {}]   ;;  %s1289_s3 = inlined_call_operand.vmem [shape: bf16[32,128], index: 3, kind: output, shape index: {}]  }
   0x1   :  { %s1162_s14 = smov 0   ;;  %s1164_s15 = smov 0  }
   0x2   :  { %s1166_s16 = smov 0  }
   0x3 LB: > { %s25_s17 = sadd.s32 1, %s1131_s15  ;;  %p48_p1 = scmp.ne.s32.totalorder %s1123_s13, %s1119_s12  ;;  %s1135_s16 = sphi %s1166_s16, %s13_s16   ;;  %s1131_s15 = sphi %s1164_s15, %s1293_s15   ;;  %s1127_s14 = sphi %s1162_s14, %s1292_s14   ;;  %s1123_s13 = sphi %s1160_s13, %s1291_s13   ;;  %s1119_s12 = sphi %s1158_s12, %s1290_s12  }
   0x4   : > { %p26_p0 = scmp.ge.s32.totalorder %s25_s17, 2  ;;  %p49_p2 = scmp.eq.s32.totalorder %s1135_s16, 0 }
   0x5   : > { %s41_s19 = sadd.s32 1, %s1123_s13  ;;  %p829_p5 = scmp.ge.s32.totalorder %s1135_s16, 2 }
   0x6   : > { %s1295_s17 = smov (%p26_p0, %s25_s17), 0  ;;  %p50_p3 = por %p49_p2, %p48_p1 }
   0x7   : > { %s37_s18 = ssub.s32 %s1131_s15, %s1295_s17  ;;  %162 = sbr.rel (%p829_p5) target bundleno = 24 (0x18), region = 20 }
   0x8   : > { %p39_p4 = scmp.eq.s32.totalorder %s37_s18, 0 }
   0xa   : > { %s1193_s20 = scalar_select %p39_p4, %s1123_s13, %s41_s19  }
   0xc   : > { %165 = sbr.rel (!%p50_p3) target bundleno = 24 (0x18), region = 24  ;;  %s167_s21 = sand.u32 (%p50_p3), 1, %s1123_s13  }
   0xd   : > { %s1003_s22 = sshll.u32 (%p50_p3), %s1131_s15, 4  ;;  %s830_s23 = sshll.u32 (%p50_p3), %s167_s21, 6 }
   0xe   : > { %s175_s26 = scalar_lea.vmem (%p50_p3), %s1286_s0, %s1003_s22  ;;  %s169_s27 = scalar_lea.vmem (%p50_p3), [#allocation3], %s830_s23 }
   0xf   : > { %v188_v0 = vld [vmem:[%s175_s26] sm:$0xff] (%p50_p3)  ;;  %v190_v1 = vld [vmem:[%s175_s26 + $0x8] sm:$0xff] (%p50_p3) }
  0x10   : > { %v192_v2 = vld [vmem:[%s175_s26 + $0x20] sm:$0xff] (%p50_p3)  ;;  %189 = vst [vmem:[%s169_s27] sm:$0xff] (%p50_p3), %v188_v0  ;;  %v194_v3 = vld [vmem:[%s175_s26 + $0x28] sm:$0xff] (%p50_p3) }
  0x11   : > { %191 = vst [vmem:[%s169_s27 + $0x8] sm:$0xff] %v190_v1  ;;  %v196_v4 = vld [vmem:[%s175_s26 + $0x40] sm:$0xff]  ;;  %v198_v5 = vld [vmem:[%s175_s26 + $0x48] sm:$0xff] }
  0x12   : > { %193 = vst [vmem:[%s169_s27 + $0x10] sm:$0xff] %v192_v2  ;;  %v200_v6 = vld [vmem:[%s175_s26 + $0x60] sm:$0xff]  ;;  %v202_v7 = vld [vmem:[%s175_s26 + $0x68] sm:$0xff] }
  0x13   : > { %195 = vst [vmem:[%s169_s27 + $0x18] sm:$0xff] %v194_v3 }
  0x14   : > { %197 = vst [vmem:[%s169_s27 + $0x20] sm:$0xff] %v196_v4 }
  0x15   : > { %199 = vst [vmem:[%s169_s27 + $0x28] sm:$0xff] %v198_v5 }
  0x16   : > { %201 = vst [vmem:[%s169_s27 + $0x30] sm:$0xff] %v200_v6 }
  0x17   : > { %203 = vst [vmem:[%s169_s27 + $0x38] sm:$0xff] %v202_v7 }
  0x18 PF: > { %p833_p6 = scmp.ge.s32.totalorder %s1135_s16, 1  ;;  %p220_p7 = scmp.lt.s32.totalorder %s1135_s16, 3 }
  0x1a   : > { %p221_p8 = pnand %p833_p6, %p220_p7 }
  0x1b   : > { %s227_s28 = sand.u32 (!%p221_p8), 1, %s1119_s12   ;;  %s835_s29 = sshll.u32 (!%p221_p8), %s1127_s14, 6 }
  0x1c   : > { %224 = sbr.rel (%p221_p8) target bundleno = 254 (0xfe), region = 51  ;;  %s834_s30 = sshll.u32 (!%p221_p8), %s227_s28, 6 }
  0x1d   : > { %p267_p9 = scmp.lt.s32.totalorder (!%p221_p8), %s835_s29, 127  ;;  %s1210_s8 = scalar_lea.vmem (!%p221_p8), [#allocation3], %s834_s30 }
  0x1e   : > { %p837_p10 = scmp.ne.s32.totalorder (!%p221_p8), %s1127_s14, 0 }
  0x21   : > { %s1297_s29 = smov (!%p267_p9, %s835_s29), 127  ;;  %290 = sbr.rel (%p837_p10) target bundleno = 43 (0x2b), region = 59 }
  0x22   : > { %s836_s4 = sshll.u32 %s1297_s29, 2 }
  0x23   : > { %s1208_s7 = scalar_lea.vmem %s1287_s1, %s836_s4 }
  0x26   : > { %v1137_v8 = vmov 0.0  }
  0x27   : > { %291 = vst [vmem:[#allocation2 + $0x10] sm:$0xff] %v1137_v8 }
  0x28   : > { %292 = vst [vmem:[#allocation2] sm:$0xff] %v1137_v8 }
  0x29   : > { %293 = vst [vmem:[#allocation2 + $0x18] sm:$0xff] %v1137_v8 }
  0x2a   : > { %294 = vst [vmem:[#allocation2 + $0x8] sm:$0xff] %v1137_v8 }
  0x2b PF: > { %v1019_v9 = vld [vmem:[%s1208_s7 + $0x38] sm:$0xff]  ;;  %v1018_v13 = vld [vmem:[%s1208_s7 + $0x30] sm:$0xff]  ;;  %v1017_v17 = vld [vmem:[%s1208_s7 + $0x28] sm:$0xff]  ;;  %p998_p11 = scmp.ne.s32.totalorder %s1127_s14, 1 }
  0x2c   : > { %v1027_v10 = vld [vmem:[%s1208_s7 + $0x78] sm:$0xff]  ;;  %603 = vmatpush.bf16.msra.mxu0 %v1019_v9  ;;  %v1026_v14 = vld [vmem:[%s1208_s7 + $0x70] sm:$0xff]  ;;  %v1025_v18 = vld [vmem:[%s1208_s7 + $0x68] sm:$0xff] }
  0x2d   : > { %v1035_v11 = vld [vmem:[%s1208_s7 + $0xb8] sm:$0xff]  ;;  %622 = vmatpush.bf16.msra.mxu1 %v1027_v10  ;;  %v1034_v15 = vld [vmem:[%s1208_s7 + $0xb0] sm:$0xff]  ;;  %v1033_v19 = vld [vmem:[%s1208_s7 + $0xa8] sm:$0xff] }
  0x2e   : > { %v1043_v12 = vld [vmem:[%s1208_s7 + $0xf8] sm:$0xff]  ;;  %641 = vmatpush.bf16.msra.mxu2 %v1035_v11  ;;  %v1042_v16 = vld [vmem:[%s1208_s7 + $0xf0] sm:$0xff]  ;;  %v1041_v20 = vld [vmem:[%s1208_s7 + $0xe8] sm:$0xff] }
  0x2f   : > { %660 = vmatpush.bf16.msra.mxu3 %v1043_v12  ;;  %v1016_v21 = vld [vmem:[%s1208_s7 + $0x20] sm:$0xff]  ;;  %v1015_v25 = vld [vmem:[%s1208_s7 + $0x18] sm:$0xff]  ;;  %v1014_v29 = vld [vmem:[%s1208_s7 + $0x10] sm:$0xff] }
  0x30   : > { %604 = vmatpush.bf16.msra.mxu0 %v1018_v13  ;;  %v1024_v22 = vld [vmem:[%s1208_s7 + $0x60] sm:$0xff]  ;;  %v1023_v26 = vld [vmem:[%s1208_s7 + $0x58] sm:$0xff]  ;;  %v1022_v30 = vld [vmem:[%s1208_s7 + $0x50] sm:$0xff] }
  0x31   : > { %623 = vmatpush.bf16.msra.mxu1 %v1026_v14  ;;  %v1032_v23 = vld [vmem:[%s1208_s7 + $0xa0] sm:$0xff]  ;;  %v1031_v27 = vld [vmem:[%s1208_s7 + $0x98] sm:$0xff]  ;;  %v1030_v31 = vld [vmem:[%s1208_s7 + $0x90] sm:$0xff] }
  0x32   : > { %642 = vmatpush.bf16.msra.mxu2 %v1034_v15  ;;  %v1040_v24 = vld [vmem:[%s1208_s7 + $0xe0] sm:$0xff]  ;;  %v1039_v28 = vld [vmem:[%s1208_s7 + $0xd8] sm:$0xff]  ;;  %v1038_v32 = vld [vmem:[%s1208_s7 + $0xd0] sm:$0xff] }
  0x33   : > { %661 = vmatpush.bf16.msra.mxu3 %v1042_v16  ;;  %v1013_v33 = vld [vmem:[%s1208_s7 + $0x8] sm:$0xff]  ;;  %v1012_v37 = vld [vmem:[%s1208_s7] sm:$0xff]  ;;  %v1006_v42 = vld [vmem:[%s1210_s8 + $0xc] sm:$0xf0] }
  0x34   : > { %605 = vmatpush.bf16.msra.mxu0 %v1017_v17  ;;  %v1021_v34 = vld [vmem:[%s1208_s7 + $0x48] sm:$0xff]  ;;  %v1020_v38 = vld [vmem:[%s1208_s7 + $0x40] sm:$0xff]  ;;  %v842_v44 = vld [vmem:[%s1210_s8 + $0x10] sm:$0xf0] }
  0x35   : > { %624 = vmatpush.bf16.msra.mxu1 %v1025_v18  ;;  %v1029_v35 = vld [vmem:[%s1208_s7 + $0x88] sm:$0xff]  ;;  %v1028_v39 = vld [vmem:[%s1208_s7 + $0x80] sm:$0xff]  ;;  %v1007_v46 = vld [vmem:[%s1210_s8 + $0x14] sm:$0xf0] }
  0x36   : > { %643 = vmatpush.bf16.msra.mxu2 %v1033_v19  ;;  %v1037_v36 = vld [vmem:[%s1208_s7 + $0xc8] sm:$0xff]  ;;  %v1036_v40 = vld [vmem:[%s1208_s7 + $0xc0] sm:$0xff]  ;;  %v850_v48 = vld [vmem:[%s1210_s8 + $0x18] sm:$0xf0] }
  0x37   : > { %662 = vmatpush.bf16.msra.mxu3 %v1041_v20  ;;  %v840_v41 = vld [vmem:[%s1210_s8] sm:$0xf]  ;;  %v1004_v43 = vld [vmem:[%s1210_s8 + $0x4] sm:$0xf]  ;;  %v848_v45 = vld [vmem:[%s1210_s8 + $0x8] sm:$0xf] }
  0x38   : > { %606 = vmatpush.bf16.msra.mxu0 %v1016_v21  ;;  %v1005_v47 = vld [vmem:[%s1210_s8 + $0xc] sm:$0xf]  ;;  %v841_v49 = vor.u32 %v1006_v42, %v840_v41  ;;  %v845_v50 = vor.u32 %v1004_v43, %v842_v44  ;;  %v849_v51 = vor.u32 %v1007_v46, %v848_v45  ;;  %v856_v53 = vld [vmem:[%s1210_s8 + $0x20] sm:$0xf]  ;;  %v1010_v54 = vld [vmem:[%s1210_s8 + $0x2c] sm:$0xf0] }
  0x39   : > { %625 = vmatpush.bf16.msra.mxu1 %v1024_v22  ;;  %v853_v52 = vor.u32 %v1005_v47, %v850_v48  ;;  %v1008_v55 = vld [vmem:[%s1210_s8 + $0x24] sm:$0xf]  ;;  %v858_v56 = vld [vmem:[%s1210_s8 + $0x30] sm:$0xf0]  ;;  %v864_v57 = vld [vmem:[%s1210_s8 + $0x28] sm:$0xf]  ;;  %v857_v61 = vor.u32 %v1010_v54, %v856_v53 }
  0x3a   : > { %644 = vmatpush.bf16.msra.mxu2 %v1032_v23  ;;  %v1011_v58 = vld [vmem:[%s1210_s8 + $0x34] sm:$0xf0]  ;;  %v1009_v59 = vld [vmem:[%s1210_s8 + $0x2c] sm:$0xf]  ;;  %v866_v60 = vld [vmem:[%s1210_s8 + $0x38] sm:$0xf0]  ;;  %v861_v62 = vor.u32 %v1008_v55, %v858_v56 }
  0x3b   : > { %663 = vmatpush.bf16.msra.mxu3 %v1040_v24  ;;  %v865_v63 = vor.u32 %v1011_v58, %v864_v57  ;;  %v869_v0 = vor.u32 %v1009_v59, %v866_v60  ;;  %v295_v9 = vld [vmem:[#allocation2 + $0x10] sm:$0xff]  ;;  %v296_v16 = vld [vmem:[#allocation2] sm:$0xff] }
  0x3c   : > { %607 = vmatpush.bf16.msra.mxu0 %v1015_v25  ;;  %v297_v25 = vld [vmem:[#allocation2 + $0x18] sm:$0xff] }
  0x3d   : > { %626 = vmatpush.bf16.msra.mxu1 %v1023_v26 }
  0x3e   : > { %645 = vmatpush.bf16.msra.mxu2 %v1031_v27 }
  0x3f   : > { %664 = vmatpush.bf16.msra.mxu3 %v1039_v28 }
  0x40   : > { %608 = vmatpush.bf16.msra.mxu0 %v1014_v29 }
  0x41   : > { %627 = vmatpush.bf16.msra.mxu1 %v1022_v30 }
  0x42   : > { %646 = vmatpush.bf16.msra.mxu2 %v1030_v31 }
  0x43   : > { %665 = vmatpush.bf16.msra.mxu3 %v1038_v32 }
  0x44   : > { %609 = vmatpush.bf16.msra.mxu0 %v1013_v33  ;;  %v298_v33 = vld [vmem:[#allocation2 + $0x8] sm:$0xff] }
  0x45   : > { %628 = vmatpush.bf16.msra.mxu1 %v1021_v34 }
  0x46   : > { %647 = vmatpush.bf16.msra.mxu2 %v1029_v35 }
  0x47   : > { %666 = vmatpush.bf16.msra.mxu3 %v1037_v36 }
  0x48   : > { %610 = vmatpush.bf16.msra.mxu0 %v1012_v37 }
  0x49   : > { %629 = vmatpush.bf16.msra.mxu1 %v1020_v38 }
  0x4a   : > { %648 = vmatpush.bf16.msra.mxu2 %v1028_v39 }
  0x4b   : > { %667 = vmatpush.bf16.msra.mxu3 %v1036_v40  ;;  %611 = vmatmul.bf16.vlgmr.msra.gmra.mxu0 %v841_v49 }
  0x4c   : > { %630 = vmatmul.bf16.vlgmr.msra.gmra.mxu1 %v845_v50 }
  0x4d   : > { %649 = vmatmul.bf16.vlgmr.msra.gmra.mxu2 %v849_v51 }
  0x4e   : > { %668 = vmatmul.bf16.vlgmr.msra.gmra.mxu3 %v853_v52 }
  0x5b   : > { %616 = vmatmul.bf16.gmra.mxu0 %v857_v61 }
  0x5c   : > { %635 = vmatmul.bf16.gmra.mxu1 %v861_v62 }
  0x5d   : > { %654 = vmatmul.bf16.gmra.mxu2 %v865_v63 }
  0x5e   : > { %673 = vmatmul.bf16.gmra.mxu3 %v869_v0 }
  0xc8   : > { %v612_v1 = vpop.f32.mrf.mxu0 }
  0xc9   : > { %v631_v2 = vpop.f32.mrf.mxu1 }
  0xca   : > { %v632_v3 = vadd.f32 %v631_v2, %v612_v1 }
  0xd0   : > { %v650_v4 = vpop.f32.mrf.mxu2  ;;  %v614_v7 = vpop.f32.mrf.mxu0 }
  0xd1   : > { %v669_v5 = vpop.f32.mrf.mxu3  ;;  %v651_v6 = vadd.f32 %v650_v4, %v632_v3  ;;  %v633_v8 = vpop.f32.mrf.mxu1 }
  0xd2   : > { %v634_v12 = vadd.f32 %v633_v8, %v614_v7 }
  0xd3   : > { %v670_v10 = vadd.f32 %v669_v5, %v651_v6 }
  0xd5   : > { %v679_v11 = vadd.f32 %v670_v10, %v295_v9 }
  0xd7   : > { %683 = vst [vmem:[#allocation2 + $0x10] sm:$0xff] %v679_v11 }
  0xd8   : > { %v652_v13 = vpop.f32.mrf.mxu2  ;;  %v617_v17 = vpop.f32.mrf.mxu0 }
  0xd9   : > { %v671_v14 = vpop.f32.mrf.mxu3  ;;  %v653_v15 = vadd.f32 %v652_v13, %v634_v12  ;;  %v636_v18 = vpop.f32.mrf.mxu1 }
  0xda   : > { %v637_v21 = vadd.f32 %v636_v18, %v617_v17 }
  0xdb   : > { %v672_v19 = vadd.f32 %v671_v14, %v653_v15 }
  0xdd   : > { %v680_v20 = vadd.f32 %v672_v19, %v296_v16 }
  0xdf   : > { %684 = vst [vmem:[#allocation2] sm:$0xff] %v680_v20 }
  0xe0   : > { %v655_v22 = vpop.f32.mrf.mxu2  ;;  %v619_v27 = vpop.f32.mrf.mxu0 }
  0xe1   : > { %v674_v23 = vpop.f32.mrf.mxu3  ;;  %v656_v24 = vadd.f32 %v655_v22, %v637_v21  ;;  %v638_v28 = vpop.f32.mrf.mxu1 }
  0xe2   : > { %v639_v30 = vadd.f32 %v638_v28, %v619_v27 }
  0xe3   : > { %v675_v26 = vadd.f32 %v674_v23, %v656_v24 }
  0xe5   : > { %v681_v29 = vadd.f32 %v675_v26, %v297_v25 }
  0xe7   : > { %685 = vst [vmem:[#allocation2 + $0x18] sm:$0xff] %v681_v29 }
  0xe8   : > { %v657_v31 = vpop.f32.mrf.mxu2 }
  0xe9   : > { %v658_v32 = vadd.f32 %v657_v31, %v639_v30  ;;  %v676_v34 = vpop.f32.mrf.mxu3 }
  0xeb   : > { %v677_v35 = vadd.f32 %v676_v34, %v658_v32  ;;  %690 = sbr.rel (%p998_p11) target bundleno = 254 (0xfe), region = 63 }
  0xed   : > { %v682_v36 = vadd.f32 %v677_v35, %v298_v33 }
  0xef   : > { %686 = vst [vmem:[#allocation2 + $0x8] sm:$0xff] %v682_v36 }
  0xf0   : > { %v691_v37 = vld [vmem:[#allocation2 + $0x10] sm:$0xff]  ;;  %v692_v38 = vld [vmem:[#allocation2] sm:$0xff]  ;;  %v693_v40 = vld [vmem:[#allocation2 + $0x18] sm:$0xff] }
  0xf1   : > { %v1096_v39 = vld [vmem:[%s1288_s2] ss:$0 sm:$0xff] }
  0xf2   : > { %v699_v42 = vadd.f32 %v1096_v39, %v691_v37  ;;  %v700_v43 = vadd.f32 %v1096_v39, %v692_v38  ;;  %v701_v44 = vadd.f32 %v1096_v39, %v693_v40 }
  0xf4   : > { %v703_v46 = vmax.f32 %v699_v42, 0.0  ;;  %v704_v47 = vmax.f32 %v700_v43, 0.0  ;;  %v705_v48 = vmax.f32 %v701_v44, 0.0 }
  0xf6   : > { %v694_v41 = vld [vmem:[#allocation2 + $0x8] sm:$0xff]  ;;  %v1047_v50 = vpack.c.bf16 %v704_v47, %v703_v46 }
  0xf7   : > { %v702_v45 = vadd.f32 %v1096_v39, %v694_v41 }
  0xf8   : > { %1048 = vst [vmem:[%s1289_s3] sm:$0xff] %v1047_v50  }
  0xf9   : > { %v706_v49 = vmax.f32 %v702_v45, 0.0 }
  0xfb   : > { %v1052_v51 = vpack.c.bf16 %v706_v49, %v705_v48 }
  0xfd   : > { %1054 = vst [vmem:[%s1289_s3 + $0x8] sm:$0xff] %v1052_v51  }
  0xfe PF: > { %s13_s16 = sadd.s32 1, %s1135_s16   ;;  %s1290_s12 = smov %s1123_s13 }
  0xff   : > { %p10_p12 = scmp.ge.s32.totalorder %s13_s16, 4   ;;  %s1291_s13 = smov %s1193_s20 }
 0x100   : > { %s1292_s14 = smov %s1131_s15  ;;  %s1293_s15 = smov %s1295_s17 }
 0x101   :  { %12 = sbr.rel (!%p10_p12) target bundleno = 3 (0x3), region = 104 }

// kernel: discriminator_forward.6
= control target key start
LH: loop header
LB: loop body
LE: loop exit
PB: predicated region body
PF: predicated region fallthrough
CT: control target
= control target key end

     0   :  { %s1251_s12 = smov 0   ;;  %s1253_s13 = smov 0   ;;  %s1441_s0 = inlined_call_operand.vmem [shape: bf16[16,1152], index: 0, kind: input, shape index: {}]   ;;  %s1442_s1 = inlined_call_operand.vmem [shape: bf16[1152,256], index: 1, kind: input, shape index: {}]   ;;  %s1443_s2 = inlined_call_operand.vmem [shape: f32[1,256], index: 2, kind: input, shape index: {}]   ;;  %s1444_s3 = inlined_call_operand.vmem [shape: bf16[16,256], index: 3, kind: output, shape index: {}]  }
   0x1   :  { %s1255_s14 = smov 0   ;;  %s1257_s15 = smov 0  }
   0x2   :  { %s1259_s16 = smov 0  }
   0x3 LB: > { %s25_s17 = sadd.s32 1, %s1224_s15  ;;  %p48_p1 = scmp.ne.s32.totalorder %s1216_s13, %s1212_s12  ;;  %s1228_s16 = sphi %s1259_s16, %s13_s16   ;;  %s1224_s15 = sphi %s1257_s15, %s1448_s15   ;;  %s1220_s14 = sphi %s1255_s14, %s1447_s14   ;;  %s1216_s13 = sphi %s1253_s13, %s1446_s13   ;;  %s1212_s12 = sphi %s1251_s12, %s1445_s12  }
   0x4   : > { %p26_p0 = scmp.ge.s32.totalorder %s25_s17, 3  ;;  %p49_p2 = scmp.eq.s32.totalorder %s1228_s16, 0 }
   0x5   : > { %s41_s19 = sadd.s32 1, %s1216_s13  ;;  %p875_p5 = scmp.ge.s32.totalorder %s1228_s16, 3 }
   0x6   : > { %s1450_s17 = smov (%p26_p0, %s25_s17), 0  ;;  %p50_p3 = por %p49_p2, %p48_p1 }
   0x7   : > { %s37_s18 = ssub.s32 %s1224_s15, %s1450_s17  ;;  %164 = sbr.rel (%p875_p5) target bundleno = 21 (0x15), region = 20 }
   0x8   : > { %p39_p4 = scmp.eq.s32.totalorder %s37_s18, 0 }
   0xa   : > { %s1286_s20 = scalar_select %p39_p4, %s1216_s13, %s41_s19  }
   0xc   : > { %167 = sbr.rel (!%p50_p3) target bundleno = 21 (0x15), region = 24  ;;  %s169_s21 = sand.u32 (%p50_p3), 1, %s1216_s13  }
   0xd   : > { %s1094_s22 = smul.u32 (%p50_p3), 12, %s1224_s15 }
   0xe   : > { %s1147_s23 = smul.u32 (%p50_p3), 24, %s169_s21 }
   0xf   : > { %s177_s26 = scalar_lea.vmem (%p50_p3), %s1441_s0, %s1094_s22 }
  0x10   : > { %v192_v0 = vld [vmem:[%s177_s26] sm:$0xff] (%p50_p3)  ;;  %v877_v2 = vld [vmem:[%s177_s26 + $0x8] sm:$0xf] (%p50_p3)  ;;  %s171_s27 = scalar_lea.vmem (%p50_p3), [#allocation3], %s1147_s23  ;;  %v879_v3 = vld [vmem:[%s177_s26 + $0x2c] sm:$0xf] (%p50_p3) }
  0x11   : > { %v194_v1 = vld [vmem:[%s177_s26 + $0x24] sm:$0xff]  ;;  %193 = vst [vmem:[%s171_s27] sm:$0xff] %v192_v0 }
  0x12   : > { %195 = vst [vmem:[%s171_s27 + $0xc] sm:$0xff] %v194_v1 }
  0x13   : > { %878 = vst [vmem:[%s171_s27 + $0x8] sm:$0xf] %v877_v2 }
  0x14   : > { %880 = vst [vmem:[%s171_s27 + $0x14] sm:$0xf] %v879_v3 }
  0x15 PF: > { %p881_p6 = scmp.ge.s32.totalorder %s1228_s16, 1  ;;  %p227_p7 = scmp.lt.s32.totalorder %s1228_s16, 4 }
  0x17   : > { %p228_p8 = pnand %p881_p6, %p227_p7 }
  0x18   : > { %s234_s28 = sand.u32 (!%p228_p8), 1, %s1212_s12   ;;  %s278_s29 = smul.u32 (!%p228_p8), 48, %s1220_s14 }
  0x19   : > { %231 = sbr.rel (%p228_p8) target bundleno = 261 (0x105), region = 54  ;;  %p884_p10 = scmp.ne.s32.totalorder (!%p228_p8), %s1220_s14, 0 }
  0x1a   : > { %s1148_s30 = smul.u32 (!%p228_p8), 24, %s234_s28  ;;  %p280_p9 = scmp.lt.s32.totalorder (!%p228_p8), %s278_s29, 143 }
  0x1c   : > { %s1303_s8 = scalar_lea.vmem (!%p228_p8), [#allocation3], %s1148_s30 }
  0x1e   : > { %s1452_s29 = smov (!%p280_p9, %s278_s29), 143  ;;  %310 = sbr.rel (%p884_p10) target bundleno = 40 (0x28), region = 62 }
  0x1f   : > { %s1095_s4 = sshll.u32 %s1452_s29, 3 }
  0x20   : > { %s1301_s7 = scalar_lea.vmem %s1442_s1, %s1095_s4 }
  0x23   : > { %v1230_v4 = vmov 0.0  }
  0x24   : > { %311 = vst [vmem:[#allocation2 + $0x10] sm:$0xff] %v1230_v4 }
  0x25   : > { %312 = vst [vmem:[#allocation2] sm:$0xff] %v1230_v4 }
  0x26   : > { %313 = vst [vmem:[#allocation2 + $0x18] sm:$0xff] %v1230_v4 }
  0x27   : > { %314 = vst [vmem:[#allocation2 + $0x8] sm:$0xff] %v1230_v4 }
  0x28 PF: > { %v955_v5 = vld [vmem:[%s1301_s7 + $0x70] sm:$0xf]  ;;  %v1114_v6 = vld [vmem:[%s1301_s7 + $0x74] sm:$0xf0]  ;;  %v947_v14 = vld [vmem:[%s1301_s7 + $0x60] sm:$0xf] }
  0x29   : > { %v1019_v7 = vld [vmem:[%s1301_s7 + $0xf0] sm:$0xf]  ;;  %v956_v8 = vor.u32 %v1114_v6, %v955_v5  ;;  %v1130_v9 = vld [vmem:[%s1301_s7 + $0xf4] sm:$0xf0]  ;;  %v1112_v15 = vld [vmem:[%s1301_s7 + $0x64] sm:$0xf0] }
  0x2a   : > { %v1083_v10 = vld [vmem:[%s1301_s7 + $0x170] sm:$0xf]  ;;  %v1146_v11 = vld [vmem:[%s1301_s7 + $0x174] sm:$0xf0]  ;;  %v1020_v12 = vor.u32 %v1130_v9, %v1019_v7  ;;  %v1011_v16 = vld [vmem:[%s1301_s7 + $0xe0] sm:$0xf]  ;;  %v948_v17 = vor.u32 %v1112_v15, %v947_v14 }
  0x2b   : > { %v1084_v13 = vor.u32 %v1146_v11, %v1083_v10  ;;  %627 = vmatpush.bf16.msra.mxu0 %v956_v8  ;;  %v1128_v18 = vld [vmem:[%s1301_s7 + $0xe4] sm:$0xf0]  ;;  %v1075_v19 = vld [vmem:[%s1301_s7 + $0x160] sm:$0xf]  ;;  %v939_v23 = vld [vmem:[%s1301_s7 + $0x50] sm:$0xf] }
  0x2c   : > { %v1144_v20 = vld [vmem:[%s1301_s7 + $0x164] sm:$0xf0]  ;;  %641 = vmatpush.bf16.msra.mxu1 %v1020_v12  ;;  %v1012_v21 = vor.u32 %v1128_v18, %v1011_v16  ;;  %v1110_v24 = vld [vmem:[%s1301_s7 + $0x54] sm:$0xf0]  ;;  %v1003_v25 = vld [vmem:[%s1301_s7 + $0xd0] sm:$0xf] }
  0x2d   : > { %655 = vmatpush.bf16.msra.mxu2 %v1084_v13  ;;  %v1076_v22 = vor.u32 %v1144_v20, %v1075_v19  ;;  %v1126_v26 = vld [vmem:[%s1301_s7 + $0xd4] sm:$0xf0]  ;;  %v1067_v27 = vld [vmem:[%s1301_s7 + $0x150] sm:$0xf]  ;;  %v940_v29 = vor.u32 %v1110_v24, %v939_v23  ;;  %v931_v30 = vld [vmem:[%s1301_s7 + $0x40] sm:$0xf] }
  0x2e   : > { %v1142_v28 = vld [vmem:[%s1301_s7 + $0x154] sm:$0xf0]  ;;  %v1108_v31 = vld [vmem:[%s1301_s7 + $0x44] sm:$0xf0]  ;;  %v1004_v32 = vor.u32 %v1126_v26, %v1003_v25  ;;  %v995_v34 = vld [vmem:[%s1301_s7 + $0xc0] sm:$0xf] }
  0x2f   : > { %628 = vmatpush.bf16.msra.mxu0 %v948_v17  ;;  %v1068_v33 = vor.u32 %v1142_v28, %v1067_v27  ;;  %v1113_v35 = vld [vmem:[%s1301_s7 + $0x74] sm:$0xf]  ;;  %v957_v36 = vld [vmem:[%s1301_s7 + $0x78] sm:$0xf0]  ;;  %v1124_v37 = vld [vmem:[%s1301_s7 + $0xc4] sm:$0xf0]  ;;  %v932_v42 = vor.u32 %v1108_v31, %v931_v30 }
  0x30   : > { %642 = vmatpush.bf16.msra.mxu1 %v1012_v21  ;;  %v1059_v38 = vld [vmem:[%s1301_s7 + $0x140] sm:$0xf]  ;;  %v1140_v39 = vld [vmem:[%s1301_s7 + $0x144] sm:$0xf0]  ;;  %v960_v40 = vor.u32 %v1113_v35, %v957_v36  ;;  %v1111_v41 = vld [vmem:[%s1301_s7 + $0x64] sm:$0xf]  ;;  %v996_v46 = vor.u32 %v1124_v37, %v995_v34 }
  0x31   : > { %656 = vmatpush.bf16.msra.mxu2 %v1076_v22  ;;  %v923_v43 = vld [vmem:[%s1301_s7 + $0x30] sm:$0xf]  ;;  %v1106_v44 = vld [vmem:[%s1301_s7 + $0x34] sm:$0xf0]  ;;  %v949_v45 = vld [vmem:[%s1301_s7 + $0x68] sm:$0xf0]  ;;  %v1060_v47 = vor.u32 %v1140_v39, %v1059_v38 }
  0x32   : > { %669 = vmatpush.bf16.msra.mxu3 %v960_v40  ;;  %v987_v48 = vld [vmem:[%s1301_s7 + $0xb0] sm:$0xf]  ;;  %v1122_v49 = vld [vmem:[%s1301_s7 + $0xb4] sm:$0xf0]  ;;  %v952_v51 = vor.u32 %v1111_v41, %v949_v45  ;;  %v1109_v53 = vld [vmem:[%s1301_s7 + $0x54] sm:$0xf]  ;;  %v924_v55 = vor.u32 %v1106_v44, %v923_v43 }
  0x33   : > { %629 = vmatpush.bf16.msra.mxu0 %v940_v29  ;;  %v1051_v50 = vld [vmem:[%s1301_s7 + $0x130] sm:$0xf]  ;;  %v1138_v52 = vld [vmem:[%s1301_s7 + $0x134] sm:$0xf0]  ;;  %v941_v54 = vld [vmem:[%s1301_s7 + $0x58] sm:$0xf0]  ;;  %v988_v59 = vor.u32 %v1122_v49, %v987_v48 }
  0x34   : > { %643 = vmatpush.bf16.msra.mxu1 %v1004_v32  ;;  %v915_v56 = vld [vmem:[%s1301_s7 + $0x20] sm:$0xf]  ;;  %v1104_v57 = vld [vmem:[%s1301_s7 + $0x24] sm:$0xf0]  ;;  %v944_v58 = vor.u32 %v1109_v53, %v941_v54  ;;  %v1052_v60 = vor.u32 %v1138_v52, %v1051_v50  ;;  %v1107_v62 = vld [vmem:[%s1301_s7 + $0x44] sm:$0xf] }
  0x35   : > { %657 = vmatpush.bf16.msra.mxu2 %v1068_v33  ;;  %v979_v61 = vld [vmem:[%s1301_s7 + $0xa0] sm:$0xf]  ;;  %v933_v63 = vld [vmem:[%s1301_s7 + $0x48] sm:$0xf0]  ;;  %v1120_v0 = vld [vmem:[%s1301_s7 + $0xa4] sm:$0xf0]  ;;  %v916_v3 = vor.u32 %v1104_v57, %v915_v56 }
  0x36   : > { %670 = vmatpush.bf16.msra.mxu3 %v952_v51  ;;  %v1043_v1 = vld [vmem:[%s1301_s7 + $0x120] sm:$0xf]  ;;  %v1136_v2 = vld [vmem:[%s1301_s7 + $0x124] sm:$0xf0]  ;;  %v907_v4 = vld [vmem:[%s1301_s7 + $0x10] sm:$0xf]  ;;  %v936_v6 = vor.u32 %v1107_v62, %v933_v63  ;;  %v980_v7 = vor.u32 %v1120_v0, %v979_v61 }
  0x37   : > { %630 = vmatpush.bf16.msra.mxu0 %v932_v42  ;;  %v1102_v5 = vld [vmem:[%s1301_s7 + $0x14] sm:$0xf0]  ;;  %v1044_v8 = vor.u32 %v1136_v2, %v1043_v1  ;;  %v971_v9 = vld [vmem:[%s1301_s7 + $0x90] sm:$0xf]  ;;  %v1105_v10 = vld [vmem:[%s1301_s7 + $0x34] sm:$0xf] }
  0x38   : > { %644 = vmatpush.bf16.msra.mxu1 %v996_v46  ;;  %v925_v11 = vld [vmem:[%s1301_s7 + $0x38] sm:$0xf0]  ;;  %v1118_v12 = vld [vmem:[%s1301_s7 + $0x94] sm:$0xf0]  ;;  %v1035_v13 = vld [vmem:[%s1301_s7 + $0x110] sm:$0xf]  ;;  %v908_v15 = vor.u32 %v1102_v5, %v907_v4 }
  0x39   : > { %658 = vmatpush.bf16.msra.mxu2 %v1060_v47  ;;  %v1134_v14 = vld [vmem:[%s1301_s7 + $0x114] sm:$0xf0]  ;;  %v899_v16 = vld [vmem:[%s1301_s7] sm:$0xf]  ;;  %v1100_v17 = vld [vmem:[%s1301_s7 + $0x4] sm:$0xf0]  ;;  %v928_v19 = vor.u32 %v1105_v10, %v925_v11  ;;  %v972_v20 = vor.u32 %v1118_v12, %v971_v9 }
  0x3a   : > { %671 = vmatpush.bf16.msra.mxu3 %v944_v58  ;;  %v963_v18 = vld [vmem:[%s1301_s7 + $0x80] sm:$0xf]  ;;  %v1036_v21 = vor.u32 %v1134_v14, %v1035_v13  ;;  %v1116_v22 = vld [vmem:[%s1301_s7 + $0x84] sm:$0xf0]  ;;  %v1103_v23 = vld [vmem:[%s1301_s7 + $0x24] sm:$0xf]  ;;  %v900_v31 = vor.u32 %v1100_v17, %v899_v16 }
  0x3b   : > { %631 = vmatpush.bf16.msra.mxu0 %v924_v55  ;;  %v917_v24 = vld [vmem:[%s1301_s7 + $0x28] sm:$0xf0]  ;;  %v1027_v25 = vld [vmem:[%s1301_s7 + $0x100] sm:$0xf]  ;;  %v1132_v26 = vld [vmem:[%s1301_s7 + $0x104] sm:$0xf0]  ;;  %v964_v36 = vor.u32 %v1116_v22, %v963_v18 }
  0x3c   : > { %645 = vmatpush.bf16.msra.mxu1 %v988_v59  ;;  %v1129_v27 = vld [vmem:[%s1301_s7 + $0xf4] sm:$0xf]  ;;  %v1021_v28 = vld [vmem:[%s1301_s7 + $0xf8] sm:$0xf0]  ;;  %v895_v32 = vld [vmem:[%s1303_s8 + $0x8] sm:$0xf]  ;;  %v920_v33 = vor.u32 %v1103_v23, %v917_v24  ;;  %v1028_v37 = vor.u32 %v1132_v26, %v1027_v25 }
  0x3d   : > { %659 = vmatpush.bf16.msra.mxu2 %v1052_v60  ;;  %v1145_v29 = vld [vmem:[%s1301_s7 + $0x174] sm:$0xf]  ;;  %v1085_v30 = vld [vmem:[%s1301_s7 + $0x178] sm:$0xf0]  ;;  %v887_v34 = vld [vmem:[%s1303_s8] sm:$0xf]  ;;  %v1024_v41 = vor.u32 %v1129_v27, %v1021_v28 }
  0x3e   : > { %672 = vmatpush.bf16.msra.mxu3 %v936_v6  ;;  %v1097_v35 = vld [vmem:[%s1303_s8 + $0x8] sm:$0xf0]  ;;  %v1098_v38 = vld [vmem:[%s1303_s8 + $0x10] sm:$0xf0]  ;;  %v1096_v39 = vld [vmem:[%s1303_s8 + $0x4] sm:$0xf]  ;;  %v1088_v42 = vor.u32 %v1145_v29, %v1085_v30 }
  0x3f   : > { %632 = vmatpush.bf16.msra.mxu0 %v916_v3  ;;  %v889_v40 = vld [vmem:[%s1303_s8 + $0xc] sm:$0xf0]  ;;  %v1127_v43 = vld [vmem:[%s1301_s7 + $0xe4] sm:$0xf]  ;;  %v1101_v44 = vld [vmem:[%s1301_s7 + $0x14] sm:$0xf]  ;;  %v888_v49 = vor.u32 %v1097_v35, %v887_v34  ;;  %v1382_v50 = vor.u32 %v1098_v38, %v895_v32 }
  0x40   : > { %646 = vmatpush.bf16.msra.mxu1 %v980_v7  ;;  %v909_v45 = vld [vmem:[%s1301_s7 + $0x18] sm:$0xf0]  ;;  %v1013_v46 = vld [vmem:[%s1301_s7 + $0xe8] sm:$0xf0]  ;;  %v1143_v47 = vld [vmem:[%s1301_s7 + $0x164] sm:$0xf]  ;;  %v1384_v51 = vor.u32 %v1096_v39, %v889_v40 }
  0x41   : > { %660 = vmatpush.bf16.msra.mxu2 %v1044_v8  ;;  %v1077_v48 = vld [vmem:[%s1301_s7 + $0x168] sm:$0xf0]  ;;  %v912_v52 = vor.u32 %v1101_v44, %v909_v45  ;;  %v1016_v53 = vor.u32 %v1127_v43, %v1013_v46  ;;  %v1125_v55 = vld [vmem:[%s1301_s7 + $0xd4] sm:$0xf]  ;;  %v1099_v56 = vld [vmem:[%s1301_s7 + $0x4] sm:$0xf] }
  0x42   : > { %673 = vmatpush.bf16.msra.mxu3 %v928_v19  ;;  %v1080_v54 = vor.u32 %v1143_v47, %v1077_v48  ;;  %v901_v57 = vld [vmem:[%s1301_s7 + $0x8] sm:$0xf0]  ;;  %v1005_v58 = vld [vmem:[%s1301_s7 + $0xd8] sm:$0xf0]  ;;  %v1141_v59 = vld [vmem:[%s1301_s7 + $0x154] sm:$0xf] }
  0x43   : > { %633 = vmatpush.bf16.msra.mxu0 %v908_v15  ;;  %v1069_v60 = vld [vmem:[%s1301_s7 + $0x158] sm:$0xf0]  ;;  %v904_v61 = vor.u32 %v1099_v56, %v901_v57  ;;  %v1008_v62 = vor.u32 %v1125_v55, %v1005_v58  ;;  %v1123_v0 = vld [vmem:[%s1301_s7 + $0xc4] sm:$0xf]  ;;  %v997_v1 = vld [vmem:[%s1301_s7 + $0xc8] sm:$0xf0] }
  0x44   : > { %647 = vmatpush.bf16.msra.mxu1 %v972_v20  ;;  %v1072_v63 = vor.u32 %v1141_v59, %v1069_v60  ;;  %v1139_v2 = vld [vmem:[%s1301_s7 + $0x144] sm:$0xf]  ;;  %v1061_v3 = vld [vmem:[%s1301_s7 + $0x148] sm:$0xf0]  ;;  %v1000_v4 = vor.u32 %v1123_v0, %v997_v1  ;;  %v1121_v6 = vld [vmem:[%s1301_s7 + $0xb4] sm:$0xf] }
  0x45   : > { %661 = vmatpush.bf16.msra.mxu2 %v1036_v21  ;;  %v1064_v5 = vor.u32 %v1139_v2, %v1061_v3  ;;  %v989_v7 = vld [vmem:[%s1301_s7 + $0xb8] sm:$0xf0]  ;;  %v1137_v8 = vld [vmem:[%s1301_s7 + $0x134] sm:$0xf]  ;;  %v1119_v12 = vld [vmem:[%s1301_s7 + $0xa4] sm:$0xf] }
  0x46   : > { %674 = vmatpush.bf16.msra.mxu3 %v920_v33  ;;  %v1053_v9 = vld [vmem:[%s1301_s7 + $0x138] sm:$0xf0]  ;;  %v992_v10 = vor.u32 %v1121_v6, %v989_v7  ;;  %v981_v13 = vld [vmem:[%s1301_s7 + $0xa8] sm:$0xf0]  ;;  %v1135_v14 = vld [vmem:[%s1301_s7 + $0x124] sm:$0xf] }
  0x47   : > { %634 = vmatpush.bf16.msra.mxu0 %v900_v31  ;;  %v1056_v11 = vor.u32 %v1137_v8, %v1053_v9  ;;  %v1045_v15 = vld [vmem:[%s1301_s7 + $0x128] sm:$0xf0]  ;;  %v984_v16 = vor.u32 %v1119_v12, %v981_v13  ;;  %v1117_v18 = vld [vmem:[%s1301_s7 + $0x94] sm:$0xf]  ;;  %v973_v19 = vld [vmem:[%s1301_s7 + $0x98] sm:$0xf0] }
  0x48   : > { %648 = vmatpush.bf16.msra.mxu1 %v964_v36  ;;  %v1048_v17 = vor.u32 %v1135_v14, %v1045_v15  ;;  %v1133_v20 = vld [vmem:[%s1301_s7 + $0x114] sm:$0xf]  ;;  %v1037_v21 = vld [vmem:[%s1301_s7 + $0x118] sm:$0xf0]  ;;  %v976_v22 = vor.u32 %v1117_v18, %v973_v19  ;;  %v1115_v24 = vld [vmem:[%s1301_s7 + $0x84] sm:$0xf] }
  0x49   : > { %662 = vmatpush.bf16.msra.mxu2 %v1028_v37  ;;  %v1040_v23 = vor.u32 %v1133_v20, %v1037_v21  ;;  %v965_v25 = vld [vmem:[%s1301_s7 + $0x88] sm:$0xf0]  ;;  %v1131_v26 = vld [vmem:[%s1301_s7 + $0x104] sm:$0xf]  ;;  %v315_v33 = vld [vmem:[#allocation2 + $0x10] sm:$0xff]  ;;  %p1089_p11 = scmp.ne.s32.totalorder %s1220_s14, 2 }
  0x4a   : > { %635 = vmatmul.bf16.vlgmr.msra.gmra.mxu0 %v888_v49  ;;  %675 = vmatpush.bf16.msra.mxu3 %v912_v52  ;;  %v1029_v27 = vld [vmem:[%s1301_s7 + $0x108] sm:$0xf0]  ;;  %v968_v28 = vor.u32 %v1115_v24, %v965_v25  ;;  %v317_v40 = vld [vmem:[#allocation2 + $0x18] sm:$0xff]  ;;  %v316_v48 = vld [vmem:[#allocation2] sm:$0xff] }
  0x4b   : > { %683 = vmatpush.bf16.msrb.mxu0 %v1024_v41  ;;  %649 = vmatmul.bf16.vlgmr.msra.gmra.mxu1 %v1384_v51  ;;  %v1032_v29 = vor.u32 %v1131_v26, %v1029_v27 }
  0x4c   : > { %697 = vmatpush.bf16.msrb.mxu1 %v1088_v42  ;;  %663 = vmatmul.bf16.vlgmr.msra.gmra.mxu2 %v1382_v50 }
  0x4e   : > { %676 = vmatpush.bf16.msra.mxu3 %v904_v61 }
  0x4f   : > { %684 = vmatpush.bf16.msrb.mxu0 %v1016_v53 }
  0x50   : > { %698 = vmatpush.bf16.msrb.mxu1 %v1080_v54  ;;  %v318_v54 = vld [vmem:[#allocation2 + $0x8] sm:$0xff] }
  0x51   : > { %677 = vmatmul.bf16.vlgmr.msra.gmra.mxu3 %v888_v49 }
  0x53   : > { %685 = vmatpush.bf16.msrb.mxu0 %v1008_v62 }
  0x54   : > { %699 = vmatpush.bf16.msrb.mxu1 %v1072_v63 }
  0x57   : > { %686 = vmatpush.bf16.msrb.mxu0 %v1000_v4 }
  0x58   : > { %700 = vmatpush.bf16.msrb.mxu1 %v1064_v5 }
  0x5b   : > { %687 = vmatpush.bf16.msrb.mxu0 %v992_v10 }
  0x5c   : > { %701 = vmatpush.bf16.msrb.mxu1 %v1056_v11 }
  0x5f   : > { %688 = vmatpush.bf16.msrb.mxu0 %v984_v16 }
  0x60   : > { %702 = vmatpush.bf16.msrb.mxu1 %v1048_v17 }
  0x63   : > { %689 = vmatpush.bf16.msrb.mxu0 %v976_v22 }
  0x64   : > { %703 = vmatpush.bf16.msrb.mxu1 %v1040_v23 }
  0x67   : > { %690 = vmatpush.bf16.msrb.mxu0 %v968_v28 }
  0x68   : > { %704 = vmatpush.bf16.msrb.mxu1 %v1032_v29 }
  0x6a   : > { %691 = vmatmul.bf16.vlgmr.msrb.gmra.mxu0 %v1384_v51 }
  0x6b   : > { %705 = vmatmul.bf16.vlgmr.msrb.gmra.mxu1 %v1382_v50 }
  0xc7   : > { %v636_v30 = vpop.f32.mrf.mxu0 }
  0xc8   : > { %v650_v31 = vpop.f32.mrf.mxu1 }
  0xc9   : > { %v651_v32 = vadd.f32 %v650_v31, %v636_v30 }
  0xcf   : > { %v664_v34 = vpop.f32.mrf.mxu2  ;;  %v638_v36 = vpop.f32.mrf.mxu0 }
  0xd0   : > { %v665_v35 = vadd.f32 %v664_v34, %v651_v32  ;;  %v652_v37 = vpop.f32.mrf.mxu1 }
  0xd1   : > { %v653_v39 = vadd.f32 %v652_v37, %v638_v36 }
  0xd2   : > { %v711_v38 = vadd.f32 %v665_v35, %v315_v33 }
  0xd4   : > { %715 = vst [vmem:[#allocation2 + $0x10] sm:$0xff] %v711_v38  ;;  %v678_v44 = vpop.f32.mrf.mxu3 }
  0xd7   : > { %v666_v41 = vpop.f32.mrf.mxu2 }
  0xd8   : > { %v667_v42 = vadd.f32 %v666_v41, %v653_v39 }
  0xda   : > { %v713_v43 = vadd.f32 %v667_v42, %v317_v40 }
  0xdc   : > { %717 = vst [vmem:[#allocation2 + $0x18] sm:$0xff] %v713_v43  ;;  %v680_v51 = vpop.f32.mrf.mxu3 }
  0xe7   : > { %v692_v45 = vpop.f32.mrf.mxu0 }
  0xe8   : > { %v706_v46 = vpop.f32.mrf.mxu1  ;;  %v693_v47 = vadd.f32 %v692_v45, %v678_v44 }
  0xea   : > { %v707_v49 = vadd.f32 %v706_v46, %v693_v47 }
  0xec   : > { %v712_v50 = vadd.f32 %v707_v49, %v316_v48 }
  0xee   : > { %716 = vst [vmem:[#allocation2] sm:$0xff] %v712_v50 }
  0xef   : > { %v694_v52 = vpop.f32.mrf.mxu0 }
  0xf0   : > { %v695_v53 = vadd.f32 %v694_v52, %v680_v51  ;;  %v708_v55 = vpop.f32.mrf.mxu1 }
  0xf2   : > { %v709_v56 = vadd.f32 %v708_v55, %v695_v53  ;;  %722 = sbr.rel (%p1089_p11) target bundleno = 261 (0x105), region = 66 }
  0xf4   : > { %v714_v57 = vadd.f32 %v709_v56, %v318_v54 }
  0xf6   : > { %718 = vst [vmem:[#allocation2 + $0x8] sm:$0xff] %v714_v57 }
  0xf7   : > { %v723_v58 = vld [vmem:[#allocation2 + $0x10] sm:$0xff]  ;;  %v724_v59 = vld [vmem:[#allocation2] sm:$0xff]  ;;  %v725_v63 = vld [vmem:[#allocation2 + $0x18] sm:$0xff] }
  0xf8   : > { %v727_v60 = vld [vmem:[%s1443_s2] sm:$0x3] }
  0xf9   : > { %v729_v61 = vperm.slane %v727_v60, 0  ;;  %v730_v62 = vperm.slane %v727_v60, 1 }
  0xfb   : > { %v733_v1 = vadd.f32 %v729_v61, %v723_v58  ;;  %v734_v2 = vadd.f32 %v730_v62, %v724_v59  ;;  %v735_v3 = vadd.f32 %v729_v61, %v725_v63 }
  0xfd   : > { %v726_v0 = vld [vmem:[#allocation2 + $0x8] sm:$0xff]  ;;  %v737_v5 = vmax.f32 %v733_v1, 0.0  ;;  %v738_v6 = vmax.f32 %v734_v2, 0.0  ;;  %v739_v7 = vmax.f32 %v735_v3, 0.0 }
  0xfe   : > { %v736_v4 = vadd.f32 %v730_v62, %v726_v0 }
  0xff   : > { %v741_v9 = vpack.c.bf16 %v738_v6, %v737_v5 }
 0x100   : > { %v740_v8 = vmax.f32 %v736_v4, 0.0 }
 0x101   : > { %743 = vst [vmem:[%s1444_s3] sm:$0xff] %v741_v9 }
 0x102   : > { %v742_v10 = vpack.c.bf16 %v740_v8, %v739_v7 }
 0x104   : > { %744 = vst [vmem:[%s1444_s3 + $0x8] sm:$0xff] %v742_v10 }
 0x105 PF: > { %s13_s16 = sadd.s32 1, %s1228_s16   ;;  %s1445_s12 = smov %s1216_s13 }
 0x106   : > { %p10_p12 = scmp.ge.s32.totalorder %s13_s16, 5   ;;  %s1446_s13 = smov %s1286_s20 }
 0x107   : > { %s1447_s14 = smov %s1224_s15  ;;  %s1448_s15 = smov %s1450_s17 }
 0x108   :  { %12 = sbr.rel (!%p10_p12) target bundleno = 3 (0x3), region = 113 }

// kernel: discriminator_forward.7
= control target key start
LH: loop header
LB: loop body
LE: loop exit
PB: predicated region body
PF: predicated region fallthrough
CT: control target
= control target key end

     0   :  { %s337_s14 = smov 0   ;;  %s376_s0 = inlined_call_operand.vmem [shape: f32[8,1024], index: 0, kind: input, shape index: {}]   ;;  %s377_s1 = inlined_call_operand.vmem [shape: f32[1,1024], index: 1, kind: input, shape index: {}]   ;;  %s378_s2 = inlined_call_operand.<no memory space> [shape: f32[1,1], index: 2, kind: input, shape index: {}]   ;;  %s379_s3 = inlined_call_operand.vmem [shape: f32[8,1], index: 3, kind: output, shape index: {}]  }
   0x1   :  { %v8_v0 = vstv %s378_s2 }
   0x2   :  { %9 = vst [vmem:[#allocation2] sm:$0x1] %v8_v0 }
   0x3 LB: > { %s343_s15 = sadd.s32 4294967295, %s311_s14   ;;  %p282_p0 = scmp.ge.s32.totalorder %s311_s14, 1  ;;  %s311_s14 = sphi %s337_s14, %s15_s14  }
   0x4   : > { %p145_p1 = scmp.lt.s32.totalorder %s311_s14, 3 }
   0x6   : > { %p146_p2 = pnand %p282_p0, %p145_p1 }
   0x7   : > { %s283_s16 = sshll.u32 (!%p146_p2), %s343_s15, 2  ;;  %p286_p4 = scmp.ne.s32.totalorder (!%p146_p2), %s343_s15, 0 }
   0x8   : > { %149 = sbr.rel (%p146_p2) target bundleno = 189 (0xbd), region = 32  ;;  %p169_p3 = scmp.lt.s32.totalorder (!%p146_p2), %s283_s16, 7 }
   0xd   : > { %s381_s16 = smov (!%p169_p3, %s283_s16), 7  ;;  %182 = sbr.rel (%p286_p4) target bundleno = 20 (0x14), region = 36 }
   0xe   : > { %s284_s2 = sshll.u32 %s381_s16, 3  ;;  %s177_s19 = scalar_lea.vmem %s377_s1, %s381_s16 }
   0xf   : > { %s172_s22 = scalar_lea.vmem %s376_s0, %s284_s2 }
  0x12   : > { %vm183_vm0 = vcmask 7168   ;;  %v313_v1 = vmov 0.0  }
  0x13   : > { %184 = vst.msk [vmem:[%s379_s3] sm:$0xff] %vm183_vm0, %v313_v1 }
  0x14 PF: > { %v186_v2 = vld [vmem:[%s172_s22] sm:$0xff]  ;;  %v187_v3 = vld [vmem:[%s172_s22 + $0x8] sm:$0xff]  ;;  %v188_v4 = vld [vmem:[%s172_s22 + $0x10] sm:$0xff]  ;;  %vm210_vm1 = vcmask 7168   ;;  %p287_p5 = scmp.ne.s32.totalorder %s343_s15, 1 }
  0x15   : > { %v190_v5 = vld [vmem:[%s177_s19] sm:$0xf]  ;;  %v189_v10 = vld [vmem:[%s172_s22 + $0x18] sm:$0xff] }
  0x16   : > { %v192_v6 = vperm.slane %v190_v5, 0  ;;  %v193_v7 = vperm.slane %v190_v5, 1  ;;  %v194_v8 = vperm.slane %v190_v5, 2  ;;  %v195_v9 = vperm.slane %v190_v5, 3 }
  0x18   : > { %v200_v11 = vmul.f32 %v192_v6, %v186_v2  ;;  %v201_v12 = vmul.f32 %v193_v7, %v187_v3  ;;  %v202_v13 = vmul.f32 %v194_v8, %v188_v4  ;;  %v203_v14 = vmul.f32 %v195_v9, %v189_v10 }
  0x1a   : > { %v204_v15 = vadd.f32 %v201_v12, %v200_v11  ;;  %v185_v18 = vld [vmem:[%s379_s3] sm:$0xff] }
  0x1c   : > { %v205_v16 = vadd.f32 %v204_v15, %v202_v13 }
  0x1e   : > { %v206_v17 = vadd.f32 %v205_v16, %v203_v14 }
  0x20   : > { %207 = vadd.xlane.f32.xlu0 %v206_v17 }
  0x92   : > { %215 = sbr.rel (%p287_p5) target bundleno = 189 (0xbd), region = 40 }
  0x93   : > { %v208_v19 = vpop.xlane.xlu0 %207 }
  0x94   : > { %v209_v20 = vadd.f32 %v208_v19, %v185_v18 }
  0x96   : > { %211 = vst.msk [vmem:[%s379_s3] sm:$0xff] %vm210_vm1, %v209_v20 }
  0x97   : > { %v300_v22 = vld [vmem:[#allocation2] ss:$0 sm:$0xff] }
  0x9d   : > { %v216_v21 = vld [vmem:[%s379_s3] sm:$0xff] }
  0x9e   : > { %v221_v23 = vadd.f32 %v300_v22, %v216_v21 }
  0xa0   : > { %v288_v24 = vmul.f32 -1.442695, %v221_v23 }
  0xa2   : > { %301 = vpow2.f32 %v288_v24 }
  0xa8   : > { %v302_v25 = vpop.eup %301 }
  0xa9   : > { %v225_v26 = vadd.f32 1.0, %v302_v25 }
  0xab   : > { %303 = vrcp.f32 %v225_v26  ;;  %v237_v29 = vand.u32 2147483648, %v225_v26  ;;  %vm231_vm2 = vweird.f32 %v225_v26  ;;  %v235_v31 = vand.u32 2147483647, %v225_v26 }
  0xad   : > { %v238_v33 = vor.u32 1.1754944e-38, %v237_v29  ;;  %vm236_vm5 = vcmp.eq.f32.partialorder %v235_v31, 8.507059e+37 }
  0xb1   : > { %v304_v27 = vpop.eup %303 }
  0xb2   : > { %v227_v28 = vmul.f32 %v304_v27, %v225_v26  ;;  %vm232_vm3 = vweird.f32 %v304_v27 }
  0xb3   : > { %vm233_vm4 = vmor %vm231_vm2, %vm232_vm3 }
  0xb4   : > { %v228_v30 = vsub.f32 1.0, %v227_v28 }
  0xb6   : > { %v229_v32 = vmul.f32 %v304_v27, %v228_v30 }
  0xb8   : > { %v230_v34 = vadd.f32 %v304_v27, %v229_v32 }
  0xba   : > { %v234_v35 = vsel %vm233_vm4, %v304_v27, %v230_v34 }
  0xbb   : > { %v239_v36 = vsel %vm236_vm5, %v238_v33, %v234_v35 }
  0xbc   : > { %241 = vst.msk [vmem:[%s379_s3] sm:$0xff] %vm210_vm1, %v239_v36 }
  0xbd PF: > { %s15_s14 = sadd.s32 1, %s311_s14  }
  0xbe   : > { %p12_p6 = scmp.ge.s32.totalorder %s15_s14, 4  }
  0xc0   :  { %14 = sbr.rel (!%p12_p6) target bundleno = 3 (0x3), region = 69 }

</bundles_post_ra>
